<compile_context>
chip_gen: v7x
topology: tpu7x:2x2x1
jax: 0.10.0
libtpu: 0.0.40
codegen_flags: <defaults>
</compile_context>

<pallas_src>
import functools

import jax
import jax.numpy as jnp
from jax.experimental import pallas as pl
from jax.experimental.pallas import tpu as pltpu

LANE = 128


# ----------------------------- fused Pallas kernel ------------------------------

def _fused_forward_kernel(p_ref, w_ref, gamma_ref, beta_ref, ind_ref, indt_ref,
                          pw_ref, fcw_ref, fcb_ref, o_ref, maxacc_ref,
                          *, eps, hw, group_size):
    n = pl.program_id(0)

    # --- stem: weight-standardized 3x3 stride-2 conv as im2col matmul (bf16 -> f32 acc)
    h = jnp.dot(p_ref[0], w_ref[...], preferred_element_type=jnp.float32)     # (HW, C)

    # --- GroupNorm(32) + ReLU; group stats via indicator matmuls (centered two-pass)
    inv_cnt = 1.0 / float(hw * group_size)
    colsum = jnp.sum(h, axis=0, keepdims=True)                                # (1, C)
    mean_g = jnp.dot(colsum, ind_ref[...],
                     preferred_element_type=jnp.float32) * inv_cnt            # (1, G)
    mean_c = jnp.dot(mean_g, indt_ref[...],
                     preferred_element_type=jnp.float32)                      # (1, C)
    centered = h - mean_c
    sqsum = jnp.sum(centered * centered, axis=0, keepdims=True)               # (1, C)
    var_g = jnp.dot(sqsum, ind_ref[...],
                    preferred_element_type=jnp.float32) * inv_cnt             # (1, G)
    inv_c = jnp.dot(jax.lax.rsqrt(var_g + eps), indt_ref[...],
                    preferred_element_type=jnp.float32)                       # (1, C)
    y = jnp.maximum(centered * inv_c * gamma_ref[...] + beta_ref[...], 0.0)   # (HW, C)

    # --- global avg pool hoisted ahead of the (linear) 1x1 projection -> (1, 2048)
    pooled_c = jnp.sum(y, axis=0, keepdims=True) * (1.0 / float(hw))          # (1, C)
    pooled_wide = jnp.dot(pooled_c.astype(jnp.bfloat16), pw_ref[...],
                          preferred_element_type=jnp.float32)                 # (1, WIDE)

    # --- running max over slices == torch.max(pooled, 0, keepdim=True)[0]
    @pl.when(n == 0)
    def _():
        maxacc_ref[...] = jnp.full_like(maxacc_ref, -jnp.inf)
    maxacc_ref[...] = jnp.maximum(maxacc_ref[...], pooled_wide)

    # --- classifier head on the last step; output is a single lane-dense (1, 128) store
    @pl.when(n == pl.num_programs(0) - 1)
    def _():
        flat = maxacc_ref[...].astype(jnp.bfloat16)                           # (1, WIDE)
        out = jnp.dot(flat, fcw_ref[...],
                      preferred_element_type=jnp.float32) + fcb_ref[...]      # (1, NCP)
        o_ref[...] = out.astype(o_ref.dtype)


def fused_covnet_forward(patches, w_mat, gamma, beta, ind, ind_t, pw,
                         fcw_pad, fcb_pad, *, groups, eps=1e-5):
    N, HW, K = patches.shape
    C = w_mat.shape[1]
    WIDE = pw.shape[1]
    NCP = fcw_pad.shape[1]
    kernel = functools.partial(_fused_forward_kernel, eps=eps, hw=HW,
                               group_size=C // groups)
    return pl.pallas_call(
        kernel,
        out_shape=jax.ShapeDtypeStruct((1, NCP), jnp.float32),
        grid_spec=pltpu.PrefetchScalarGridSpec(
            num_scalar_prefetch=0,
            grid=(N,),
            in_specs=[
                pl.BlockSpec((1, HW, K), lambda n: (n, 0, 0)),   # im2col patches (per sample)
                pl.BlockSpec((K, C), lambda n: (0, 0)),          # stem weight (kh*kw*IC, C)
                pl.BlockSpec((1, C), lambda n: (0, 0)),          # GN gamma
                pl.BlockSpec((1, C), lambda n: (0, 0)),          # GN beta
                pl.BlockSpec((C, groups), lambda n: (0, 0)),     # channel -> group indicator
                pl.BlockSpec((groups, C), lambda n: (0, 0)),     # group -> channel indicator
                pl.BlockSpec((C, WIDE), lambda n: (0, 0)),       # 1x1 projection weight
                pl.BlockSpec((WIDE, NCP), lambda n: (0, 0)),     # fc weight (lane padded)
                pl.BlockSpec((1, NCP), lambda n: (0, 0)),        # fc bias (lane padded)
            ],
            out_specs=pl.BlockSpec((1, NCP), lambda n: (0, 0)),
            scratch_shapes=[pltpu.VMEM((1, WIDE), jnp.float32)],  # running-max accumulator
        ),
        compiler_params=pltpu.CompilerParams(
            # Running-max accumulator + last-step output => sequential over samples.
            # TODO(synk): with a real backbone, add a leading "parallel" row-split axis so
            # both v7x TensorCores are used.
            dimension_semantics=("arbitrary",)),
    )(patches, w_mat, gamma, beta, ind, ind_t, pw, fcw_pad, fcb_pad)


# ------------------------------- JAX glue ----------------------------------

def im2col_nhwc(x_nhwc, kh, kw, stride, pad):
    N, H, W, C = x_nhwc.shape
    xp = jnp.pad(x_nhwc, ((0, 0), (pad, pad), (pad, pad), (0, 0)))
    OH = (H + 2 * pad - kh) // stride + 1
    OW = (W + 2 * pad - kw) // stride + 1
    cols = []
    for i in range(kh):
        for j in range(kw):
            cols.append(xp[:, i:i + stride * OH:stride, j:j + stride * OW:stride, :])
    patches = jnp.stack(cols, axis=-2)                 # (N, OH, OW, kh*kw, C)
    return patches.reshape(N, OH * OW, kh * kw * C), (N, OH, OW)


def standardize_conv_weight(w, eps=1e-6):
    """BiT-style weight standardization: per output filter over (IC, kh, kw)."""
    oc = w.shape[0]
    wf = w.reshape(oc, -1)
    mean = jnp.mean(wf, axis=1, keepdims=True)
    var = jnp.mean((wf - mean) ** 2, axis=1, keepdims=True)
    return ((wf - mean) * jax.lax.rsqrt(var + eps)).reshape(w.shape)


def init_params(key, n_classes):
    k1, k2, k3, k4, k5, k6 = jax.random.split(key, 6)
    return {
        "stem_w": jax.random.normal(k1, (64, 3, 3, 3), jnp.float32) * 0.1,      # (OC,IC,kh,kw)
        "gn_gamma": jnp.ones((64,), jnp.float32) + 0.05 * jax.random.normal(k2, (64,)),
        "gn_beta": 0.05 * jax.random.normal(k3, (64,), jnp.float32),
        "proj_w": jax.random.normal(k4, (2048, 64, 1, 1), jnp.float32) * 0.05,   # (OC,IC,1,1)
        "fc_w": jax.random.normal(k5, (n_classes, 2048), jnp.float32) * 0.02,    # torch Linear weight
        "fc_b": 0.01 * jax.random.normal(k6, (n_classes,), jnp.float32),
    }


def covnet_forward(params, x, *, n_classes):
    # x: (1, N, C, H, W)  -- torch.squeeze(x, dim=0)
    x = jnp.squeeze(x, axis=0)                               # (N, C, H, W)
    x = jnp.transpose(x, (0, 2, 3, 1)).astype(jnp.float32)   # NHWC

    # --- stem weight: (OC, IC, kh, kw) -> (kh*kw*IC, OC), standardized, bf16 MXU operand
    w = standardize_conv_weight(params["stem_w"])            # (64, 3, 3, 3)
    C = w.shape[0]
    w_mat = jnp.transpose(w, (2, 3, 1, 0)).reshape(-1, C)    # (27, 64), matches patch order

    # --- im2col in the wrapper (tiny at these shapes), bf16 operands, K padded to 32.
    # TODO(synk): for a realistic 7x7 stem at 224x224, gather patches inside the kernel
    # (pl.ANY x ref + strided reads) instead of materializing im2col in HBM.
    patches, (N, OH, OW) = im2col_nhwc(x, 3, 3, stride=2, pad=1)   # (N, OH*OW, 27)
    K = patches.shape[-1]
    Kp = ((K + 31) // 32) * 32
    if Kp != K:
        patches = jnp.pad(patches, ((0, 0), (0, 0), (0, Kp - K)))
        w_mat = jnp.pad(w_mat, ((0, Kp - K), (0, 0)))
    patches = patches.astype(jnp.bfloat16)
    w_mat = w_mat.astype(jnp.bfloat16)

    # --- GroupNorm(32) params + channel/group indicator matrices
    groups = 32
    ind = (jnp.arange(C)[:, None] // (C // groups)
           == jnp.arange(groups)[None, :]).astype(jnp.float32)     # (C, G)
    gamma = params["gn_gamma"].reshape(1, C).astype(jnp.float32)
    beta = params["gn_beta"].reshape(1, C).astype(jnp.float32)

    # --- 1x1 weight-standardized projection to 2048 channels (pool is hoisted before it)
    pw = standardize_conv_weight(params["proj_w"]).reshape(2048, C).T.astype(jnp.bfloat16)  # (C, 2048)

    # --- fc: pad n_classes up to 128 lanes -> unmasked weight loads and output store
    ncp = ((n_classes + LANE - 1) // LANE) * LANE
    fcw_pad = jnp.zeros((2048, ncp), jnp.bfloat16).at[:, :n_classes].set(
        params["fc_w"].T.astype(jnp.bfloat16))
    fcb_pad = jnp.zeros((1, ncp), jnp.float32).at[:, :n_classes].set(
        params["fc_b"].reshape(1, -1))

    out_pad = fused_covnet_forward(patches, w_mat, gamma, beta, ind, ind.T,
                                   pw, fcw_pad, fcb_pad, groups=groups)
    return out_pad[:, :n_classes]                             # (1, n_classes)


if __name__ == "__main__":
    n_classes = 4
    key = jax.random.PRNGKey(0)
    kx, kp = jax.random.split(key)
    # small, forward-consistent shapes: 2 slices, 3 channels, 32x32 spatial
    x = jax.random.normal(kx, (1, 2, 3, 32, 32), dtype=jnp.float32)
    params = init_params(kp, n_classes)

    fwd = jax.jit(functools.partial(covnet_forward, n_classes=n_classes))
    out = jax.block_until_ready(fwd(params, x))
    assert out.shape == (1, n_classes), out.shape
    assert bool(jnp.all(jnp.isfinite(out)))
    print("KERNEL_OK")
</pallas_src>

<mosaic_0001>
module attributes {stable_mosaic.version = 11 : i64} {
  func.func @_fused_forward_kernel(%arg0: i32, %arg1: memref<1x256x32xbf16, #tpu.memory_space<vmem>>, %arg2: memref<32x64xbf16, #tpu.memory_space<vmem>>, %arg3: memref<1x64xf32, #tpu.memory_space<vmem>>, %arg4: memref<1x64xf32, #tpu.memory_space<vmem>>, %arg5: memref<64x32xf32, #tpu.memory_space<vmem>>, %arg6: memref<32x64xf32, #tpu.memory_space<vmem>>, %arg7: memref<64x2048xbf16, #tpu.memory_space<vmem>>, %arg8: memref<2048x128xbf16, #tpu.memory_space<vmem>>, %arg9: memref<1x128xf32, #tpu.memory_space<vmem>>, %arg10: memref<1x128xf32, #tpu.memory_space<vmem>>, %arg11: memref<1x2048xf32, #tpu.memory_space<vmem>>) attributes {dimension_semantics = [#tpu.dimension_semantics<arbitrary>], iteration_bounds = array<i64: 2>, scalar_prefetch = 0 : i64, scratch_operands = 1 : i64, tpu.core_type = #tpu.core_type<tc>, window_params = [{transform_indices = @transform_0, window_bounds = array<i64: 1, 256, 32>}, {pipeline_mode = #tpu.pipeline_mode<synchronous>, transform_indices = @transform_1, window_bounds = array<i64: 32, 64>}, {pipeline_mode = #tpu.pipeline_mode<synchronous>, transform_indices = @transform_2, window_bounds = array<i64: 1, 64>}, {pipeline_mode = #tpu.pipeline_mode<synchronous>, transform_indices = @transform_3, window_bounds = array<i64: 1, 64>}, {pipeline_mode = #tpu.pipeline_mode<synchronous>, transform_indices = @transform_4, window_bounds = array<i64: 64, 32>}, {pipeline_mode = #tpu.pipeline_mode<synchronous>, transform_indices = @transform_5, window_bounds = array<i64: 32, 64>}, {pipeline_mode = #tpu.pipeline_mode<synchronous>, transform_indices = @transform_6, window_bounds = array<i64: 64, 2048>}, {pipeline_mode = #tpu.pipeline_mode<synchronous>, transform_indices = @transform_7, window_bounds = array<i64: 2048, 128>}, {pipeline_mode = #tpu.pipeline_mode<synchronous>, transform_indices = @transform_8, window_bounds = array<i64: 1, 128>}, {pipeline_mode = #tpu.pipeline_mode<synchronous>, transform_indices = @transform_9, window_bounds = array<i64: 1, 128>}]} {
    %c0 = arith.constant 0 : index
    %c0_0 = arith.constant 0 : index
    %c0_1 = arith.constant 0 : index
    %0 = vector.load %arg1[%c0, %c0_0, %c0_1] : memref<1x256x32xbf16, #tpu.memory_space<vmem>>, vector<1x256x32xbf16>
    %1 = vector.shape_cast %0 : vector<1x256x32xbf16> to vector<256x32xbf16>
    %c0_2 = arith.constant 0 : index
    %c0_3 = arith.constant 0 : index
    %2 = vector.load %arg2[%c0_2, %c0_3] : memref<32x64xbf16, #tpu.memory_space<vmem>>, vector<32x64xbf16>
    %cst = arith.constant dense<0.000000e+00> : vector<256x64xf32>
    %3 = tpu.matmul %1, %2, %cst {dimension_numbers = #tpu.dot_dimension_numbers<[1], [0], [0], [1], [0, 0, 1, 1], [], []>} : vector<256x32xbf16>, vector<32x64xbf16>, vector<256x64xf32> -> vector<256x64xf32>
    %cst_4 = arith.constant dense<0.000000e+00> : vector<64xf32>
    %4 = vector.multi_reduction <add>, %3, %cst_4 [0] : vector<256x64xf32> to vector<64xf32>
    %5 = vector.shape_cast %4 : vector<64xf32> to vector<1x64xf32>
    %c0_5 = arith.constant 0 : index
    %c0_6 = arith.constant 0 : index
    %6 = vector.load %arg5[%c0_5, %c0_6] : memref<64x32xf32, #tpu.memory_space<vmem>>, vector<64x32xf32>
    %cst_7 = arith.constant dense<0.000000e+00> : vector<1x32xf32>
    %7 = tpu.matmul %5, %6, %cst_7 {dimension_numbers = #tpu.dot_dimension_numbers<[1], [0], [0], [1], [0, 0, 1, 1], [], []>} : vector<1x64xf32>, vector<64x32xf32>, vector<1x32xf32> -> vector<1x32xf32>
    %cst_8 = arith.constant 0.001953125 : f32
    %8 = vector.broadcast %cst_8 : f32 to vector<1x32xf32>
    %9 = arith.mulf %7, %8 : vector<1x32xf32>
    %c0_9 = arith.constant 0 : index
    %c0_10 = arith.constant 0 : index
    %10 = vector.load %arg6[%c0_9, %c0_10] : memref<32x64xf32, #tpu.memory_space<vmem>>, vector<32x64xf32>
    %cst_11 = arith.constant dense<0.000000e+00> : vector<1x64xf32>
    %11 = tpu.matmul %9, %10, %cst_11 {dimension_numbers = #tpu.dot_dimension_numbers<[1], [0], [0], [1], [0, 0, 1, 1], [], []>} : vector<1x32xf32>, vector<32x64xf32>, vector<1x64xf32> -> vector<1x64xf32>
    %12 = vector.broadcast %11 : vector<1x64xf32> to vector<256x64xf32>
    %13 = arith.subf %3, %12 : vector<256x64xf32>
    %14 = arith.mulf %13, %13 : vector<256x64xf32>
    %cst_12 = arith.constant dense<0.000000e+00> : vector<64xf32>
    %15 = vector.multi_reduction <add>, %14, %cst_12 [0] : vector<256x64xf32> to vector<64xf32>
    %16 = vector.shape_cast %15 : vector<64xf32> to vector<1x64xf32>
    %c0_13 = arith.constant 0 : index
    %c0_14 = arith.constant 0 : index
    %17 = vector.load %arg5[%c0_13, %c0_14] : memref<64x32xf32, #tpu.memory_space<vmem>>, vector<64x32xf32>
    %cst_15 = arith.constant dense<0.000000e+00> : vector<1x32xf32>
    %18 = tpu.matmul %16, %17, %cst_15 {dimension_numbers = #tpu.dot_dimension_numbers<[1], [0], [0], [1], [0, 0, 1, 1], [], []>} : vector<1x64xf32>, vector<64x32xf32>, vector<1x32xf32> -> vector<1x32xf32>
    %cst_16 = arith.constant 0.001953125 : f32
    %19 = vector.broadcast %cst_16 : f32 to vector<1x32xf32>
    %20 = arith.mulf %18, %19 : vector<1x32xf32>
    %cst_17 = arith.constant 9.99999974E-6 : f32
    %21 = vector.broadcast %cst_17 : f32 to vector<1x32xf32>
    %22 = arith.addf %20, %21 : vector<1x32xf32>
    %23 = math.rsqrt %22 : vector<1x32xf32>
    %c0_18 = arith.constant 0 : index
    %c0_19 = arith.constant 0 : index
    %24 = vector.load %arg6[%c0_18, %c0_19] : memref<32x64xf32, #tpu.memory_space<vmem>>, vector<32x64xf32>
    %cst_20 = arith.constant dense<0.000000e+00> : vector<1x64xf32>
    %25 = tpu.matmul %23, %24, %cst_20 {dimension_numbers = #tpu.dot_dimension_numbers<[1], [0], [0], [1], [0, 0, 1, 1], [], []>} : vector<1x32xf32>, vector<32x64xf32>, vector<1x64xf32> -> vector<1x64xf32>
    %26 = vector.broadcast %25 : vector<1x64xf32> to vector<256x64xf32>
    %27 = arith.mulf %13, %26 : vector<256x64xf32>
    %c0_21 = arith.constant 0 : index
    %c0_22 = arith.constant 0 : index
    %28 = vector.load %arg3[%c0_21, %c0_22] : memref<1x64xf32, #tpu.memory_space<vmem>>, vector<1x64xf32>
    %29 = vector.broadcast %28 : vector<1x64xf32> to vector<256x64xf32>
    %30 = arith.mulf %27, %29 : vector<256x64xf32>
    %c0_23 = arith.constant 0 : index
    %c0_24 = arith.constant 0 : index
    %31 = vector.load %arg4[%c0_23, %c0_24] : memref<1x64xf32, #tpu.memory_space<vmem>>, vector<1x64xf32>
    %32 = vector.broadcast %31 : vector<1x64xf32> to vector<256x64xf32>
    %33 = arith.addf %30, %32 : vector<256x64xf32>
    %cst_25 = arith.constant 0.000000e+00 : f32
    %34 = vector.broadcast %cst_25 : f32 to vector<256x64xf32>
    %35 = arith.maximumf %33, %34 : vector<256x64xf32>
    %cst_26 = arith.constant dense<0.000000e+00> : vector<64xf32>
    %36 = vector.multi_reduction <add>, %35, %cst_26 [0] : vector<256x64xf32> to vector<64xf32>
    %37 = vector.shape_cast %36 : vector<64xf32> to vector<1x64xf32>
    %cst_27 = arith.constant 3.906250e-03 : f32
    %38 = vector.broadcast %cst_27 : f32 to vector<1x64xf32>
    %39 = arith.mulf %37, %38 : vector<1x64xf32>
    %40 = arith.truncf %39 : vector<1x64xf32> to vector<1x64xbf16>
    %c0_28 = arith.constant 0 : index
    %c0_29 = arith.constant 0 : index
    %41 = vector.load %arg7[%c0_28, %c0_29] : memref<64x2048xbf16, #tpu.memory_space<vmem>>, vector<64x2048xbf16>
    %cst_30 = arith.constant dense<0.000000e+00> : vector<1x2048xf32>
    %42 = tpu.matmul %40, %41, %cst_30 {dimension_numbers = #tpu.dot_dimension_numbers<[1], [0], [0], [1], [0, 0, 1, 1], [], []>} : vector<1x64xbf16>, vector<64x2048xbf16>, vector<1x2048xf32> -> vector<1x2048xf32>
    %c0_i32 = arith.constant 0 : i32
    %43 = arith.cmpi eq, %arg0, %c0_i32 : i32
    %44 = arith.extui %43 : i1 to i32
    %c0_i32_31 = arith.constant 0 : i32
    %45 = arith.cmpi ne, %44, %c0_i32_31 : i32
    scf.if %45 {
      %cst_37 = arith.constant 0xFF800000 : f32
      %52 = vector.broadcast %cst_37 : f32 to vector<1x2048xf32>
      %c0_38 = arith.constant 0 : index
      %c0_39 = arith.constant 0 : index
      %53 = vector.load %arg11[%c0_38, %c0_39] : memref<1x2048xf32, #tpu.memory_space<vmem>>, vector<1x2048xf32>
      tpu.vector_store %arg11[%c0_38, %c0_39], %52 {strides = array<i32>} : memref<1x2048xf32, #tpu.memory_space<vmem>>, vector<1x2048xf32>,
    } else {
    }
    %c0_32 = arith.constant 0 : index
    %c0_33 = arith.constant 0 : index
    %46 = vector.load %arg11[%c0_32, %c0_33] : memref<1x2048xf32, #tpu.memory_space<vmem>>, vector<1x2048xf32>
    %47 = arith.maximumf %46, %42 : vector<1x2048xf32>
    %c0_34 = arith.constant 0 : index
    %c0_35 = arith.constant 0 : index
    %48 = vector.load %arg11[%c0_34, %c0_35] : memref<1x2048xf32, #tpu.memory_space<vmem>>, vector<1x2048xf32>
    tpu.vector_store %arg11[%c0_34, %c0_35], %47 {strides = array<i32>} : memref<1x2048xf32, #tpu.memory_space<vmem>>, vector<1x2048xf32>,
    %c1_i32 = arith.constant 1 : i32
    %49 = arith.cmpi eq, %arg0, %c1_i32 : i32
    %50 = arith.extui %49 : i1 to i32
    %c0_i32_36 = arith.constant 0 : i32
    %51 = arith.cmpi ne, %50, %c0_i32_36 : i32
    scf.if %51 {
      %c0_37 = arith.constant 0 : index
      %c0_38 = arith.constant 0 : index
      %52 = vector.load %arg11[%c0_37, %c0_38] : memref<1x2048xf32, #tpu.memory_space<vmem>>, vector<1x2048xf32>
      %53 = arith.truncf %52 : vector<1x2048xf32> to vector<1x2048xbf16>
      %c0_39 = arith.constant 0 : index
      %c0_40 = arith.constant 0 : index
      %54 = vector.load %arg8[%c0_39, %c0_40] : memref<2048x128xbf16, #tpu.memory_space<vmem>>, vector<2048x128xbf16>
      %cst_41 = arith.constant dense<0.000000e+00> : vector<1x128xf32>
      %55 = tpu.matmul %53, %54, %cst_41 {dimension_numbers = #tpu.dot_dimension_numbers<[1], [0], [0], [1], [0, 0, 1, 1], [], []>} : vector<1x2048xbf16>, vector<2048x128xbf16>, vector<1x128xf32> -> vector<1x128xf32>
      %c0_42 = arith.constant 0 : index
      %c0_43 = arith.constant 0 : index
      %56 = vector.load %arg9[%c0_42, %c0_43] : memref<1x128xf32, #tpu.memory_space<vmem>>, vector<1x128xf32>
      %57 = arith.addf %55, %56 : vector<1x128xf32>
      %c0_44 = arith.constant 0 : index
      %c0_45 = arith.constant 0 : index
      %58 = vector.load %arg10[%c0_44, %c0_45] : memref<1x128xf32, #tpu.memory_space<vmem>>, vector<1x128xf32>
      tpu.vector_store %arg10[%c0_44, %c0_45], %57 {strides = array<i32>} : memref<1x128xf32, #tpu.memory_space<vmem>>, vector<1x128xf32>,
    } else {
    }
    return
  }
  func.func @transform_0(%arg0: i32) -> (i32, i32, i32) {
    %c0_i32 = arith.constant 0 : i32
    %c0_i32_0 = arith.constant 0 : i32
    %c0_i32_1 = arith.constant 0 : i32
    return %arg0, %c0_i32, %c0_i32_0 : i32, i32, i32
  }
  func.func @transform_1(%arg0: i32) -> (i32, i32) {
    %c0_i32 = arith.constant 0 : i32
    %c0_i32_0 = arith.constant 0 : i32
    %c0_i32_1 = arith.constant 0 : i32
    return %c0_i32, %c0_i32_0 : i32, i32
  }
  func.func @transform_2(%arg0: i32) -> (i32, i32) {
    %c0_i32 = arith.constant 0 : i32
    %c0_i32_0 = arith.constant 0 : i32
    %c0_i32_1 = arith.constant 0 : i32
    return %c0_i32, %c0_i32_0 : i32, i32
  }
  func.func @transform_3(%arg0: i32) -> (i32, i32) {
    %c0_i32 = arith.constant 0 : i32
    %c0_i32_0 = arith.constant 0 : i32
    %c0_i32_1 = arith.constant 0 : i32
    return %c0_i32, %c0_i32_0 : i32, i32
  }
  func.func @transform_4(%arg0: i32) -> (i32, i32) {
    %c0_i32 = arith.constant 0 : i32
    %c0_i32_0 = arith.constant 0 : i32
    %c0_i32_1 = arith.constant 0 : i32
    return %c0_i32, %c0_i32_0 : i32, i32
  }
  func.func @transform_5(%arg0: i32) -> (i32, i32) {
    %c0_i32 = arith.constant 0 : i32
    %c0_i32_0 = arith.constant 0 : i32
    %c0_i32_1 = arith.constant 0 : i32
    return %c0_i32, %c0_i32_0 : i32, i32
  }
  func.func @transform_6(%arg0: i32) -> (i32, i32) {
    %c0_i32 = arith.constant 0 : i32
    %c0_i32_0 = arith.constant 0 : i32
    %c0_i32_1 = arith.constant 0 : i32
    return %c0_i32, %c0_i32_0 : i32, i32
  }
  func.func @transform_7(%arg0: i32) -> (i32, i32) {
    %c0_i32 = arith.constant 0 : i32
    %c0_i32_0 = arith.constant 0 : i32
    %c0_i32_1 = arith.constant 0 : i32
    return %c0_i32, %c0_i32_0 : i32, i32
  }
  func.func @transform_8(%arg0: i32) -> (i32, i32) {
    %c0_i32 = arith.constant 0 : i32
    %c0_i32_0 = arith.constant 0 : i32
    %c0_i32_1 = arith.constant 0 : i32
    return %c0_i32, %c0_i32_0 : i32, i32
  }
  func.func @transform_9(%arg0: i32) -> (i32, i32) {
    %c0_i32 = arith.constant 0 : i32
    %c0_i32_0 = arith.constant 0 : i32
    %c0_i32_1 = arith.constant 0 : i32
    return %c0_i32, %c0_i32_0 : i32, i32
  }
}

</mosaic_0001>

<bundles_post_ra>
// kernel: covnet_forward.1
= control target key start
LH: loop header
LB: loop body
LE: loop exit
PB: predicated region body
PF: predicated region fallthrough
CT: control target
= control target key end

     0   :  { %14 = vsyncpa [#allocation4], 0  ;;  %s4600_s30 = smov 0   ;;  %s5951_s0 = inlined_call_operand.vmem [shape: bf16[2,256,32], index: 0, kind: input, shape index: {}]   ;;  %s5952_s1 = inlined_call_operand.vmem [shape: bf16[32,64], index: 1, kind: input, shape index: {}]   ;;  %s5953_s2 = inlined_call_operand.vmem [shape: f32[1,64], index: 2, kind: input, shape index: {}]   ;;  %s5954_s3 = inlined_call_operand.vmem [shape: f32[1,64], index: 3, kind: input, shape index: {}]   ;;  %s5955_s4 = inlined_call_operand.vmem [shape: f32[64,32], index: 4, kind: input, shape index: {}]   ;;  %s5956_s5 = inlined_call_operand.vmem [shape: f32[32,64], index: 5, kind: input, shape index: {}]   ;;  %s5957_s6 = inlined_call_operand.vmem [shape: bf16[64,2048], index: 6, kind: input, shape index: {}]   ;;  %s5958_s7 = inlined_call_operand.vmem [shape: bf16[2048,128], index: 7, kind: input, shape index: {}]   ;;  %s5959_s8 = inlined_call_operand.vmem [shape: f32[1,128], index: 8, kind: input, shape index: {}]   ;;  %s5960_s9 = inlined_call_operand.hbm [shape: f32[1,128], index: 9, kind: output, shape index: {}]  }
   0x1 LB: > { %s4606_s10 = sadd.s32 4294967295, %s4541_s30   ;;  %p3732_p0 = scmp.ge.s32.totalorder %s4541_s30, 1  ;;  %s4541_s30 = sphi %s4600_s30, %s20_s30  }
   0x2   : > { %p283_p1 = scmp.lt.s32.totalorder %s4541_s30, 3 }
   0x4   : > { %p284_p2 = pnand %p3732_p0, %p283_p1 }
   0x5   : > { %v4357_v0 = vld [vmem:[%s5952_s1] sm:$0xff] (!%p284_p2)   ;;  %p314_p3 = scmp.lt.s32.totalorder (!%p284_p2), %s4606_s10, 1  ;;  %v4358_v1 = vld [vmem:[%s5952_s1 + $0x8] sm:$0xff] (!%p284_p2)   ;;  %vm448_vm0 = vcmask (!%p284_p2), 261120   ;;  %v4543_v21 = vmov (!%p284_p2), 0.0|0.0   ;;  %v730_v22 = vld [vmem:[%s5955_s4 + $0x10] sm:$0xff] (!%p284_p2) }
   0x6   : > { %287 = sbr.rel (%p284_p2) target bundleno = 1989 (0x7c5), region = 56  ;;  %4204 = vmatprep.subr.bf16.mxu0 (!%p284_p2), %v4357_v0  ;;  %v728_v18 = vld [vmem:[%s5955_s4] sm:$0xff] (!%p284_p2)  ;;  %v729_v19 = vld [vmem:[%s5955_s4 + $0x8] sm:$0xff] (!%p284_p2)  ;;  %4300 = vmatprep.subr.bf16.mxu1 (!%p284_p2), %v4543_v21  ;;  %v731_v23 = vld [vmem:[%s5955_s4 + $0x18] sm:$0xff] (!%p284_p2)  ;;  %vm4544_vm1 = vmmov (!%p284_p2), 0   ;;  %v4545_v31 = vmov (!%p284_p2), 0.0  }
   0x7   : > { %4205 = vmatpush3.bf16.msra.mxu0 (!%p284_p2), %v4357_v0  ;;  %v4661_v20 = vpack.c.bf16 (!%p284_p2), %v729_v19, %v728_v18  ;;  %v4672_v24 = vpack.c.bf16 (!%p284_p2), %v731_v23, %v730_v22  ;;  %v732_v25 = vld [vmem:[%s5955_s4 + $0x20] sm:$0xff] (!%p284_p2)  ;;  %v733_v26 = vld [vmem:[%s5955_s4 + $0x28] sm:$0xff] (!%p284_p2)  ;;  %v734_v28 = vld [vmem:[%s5955_s4 + $0x30] sm:$0xff] (!%p284_p2)  ;;  %4256 = vmatprep.mubr.msk.f32.mxu1 (!%p284_p2), %vm4544_vm1, %v4545_v31  ;;  %vm658_vm2 = vcmask (!%p284_p2), 523264   ;;  %p3847_p4 = scmp.ne.s32.totalorder (!%p284_p2), %s4606_s10, 0 }
   0x8   : > { %4206 = vmatprep.subr.bf16.mxu0 (!%p284_p2), %v4358_v1  ;;  %v4682_v27 = vpack.c.bf16 (!%p284_p2), %v733_v26, %v732_v25  ;;  %v735_v29 = vld [vmem:[%s5955_s4 + $0x38] sm:$0xff] (!%p284_p2) }
   0x9   : > { %4302 = vmatpush3.bf16.msra.mxu1 (!%p284_p2), %v4661_v20  ;;  %v4691_v30 = vpack.c.bf16 (!%p284_p2), %v735_v29, %v734_v28 }
   0xa   : > { %4303 = vmatprep.subr.bf16.mxu1 (!%p284_p2), %v4543_v21 }
   0xb   : > { %4207 = vmatpush3.bf16.msra.mxu0 (!%p284_p2), %v4358_v1 }
   0xd   : > { %s315_s15 = scalar_select %p314_p3, %s4606_s10, 1  ;;  %4305 = vmatpush3.bf16.msra.mxu1 %v4672_v24 }
   0xe   : > { %4306 = vmatprep.subr.bf16.mxu1 %v4543_v21 }
   0xf   : > { %s3981_s16 = sshll.u32 %s315_s15, 7 }
  0x10   : > { %s4621_s19 = scalar_lea.vmem %s5951_s0, %s3981_s16 }
  0x11   : > { %v4359_v2 = vld [vmem:[%s4621_s19] sm:$0xff]   ;;  %v4360_v3 = vld [vmem:[%s4621_s19 + $0x8] sm:$0xff]   ;;  %v4361_v4 = vld [vmem:[%s4621_s19 + $0x10] sm:$0xff]   ;;  %4308 = vmatpush3.bf16.msra.mxu1 %v4682_v27 }
  0x12   : > { %4208 = vmatprep.mubr.msk.bf16.mxu0 %vm448_vm0, %v4359_v2  ;;  %v4362_v5 = vld [vmem:[%s4621_s19 + $0x18] sm:$0xff]   ;;  %v4363_v6 = vld [vmem:[%s4621_s19 + $0x20] sm:$0xff]   ;;  %v4364_v7 = vld [vmem:[%s4621_s19 + $0x28] sm:$0xff]   ;;  %4309 = vmatprep.subr.bf16.mxu1 %v4543_v21 }
  0x13   : > { %4209 = vmatmul.mubr.msk.bf16.vlgmr.msra.gmra.mrb[0].mxu0 %vm448_vm0, %v4360_v3  ;;  %v4365_v8 = vld [vmem:[%s4621_s19 + $0x30] sm:$0xff]   ;;  %v4366_v9 = vld [vmem:[%s4621_s19 + $0x38] sm:$0xff]   ;;  %v4367_v10 = vld [vmem:[%s4621_s19 + $0x40] sm:$0xff]  }
  0x14   : > { %4212 = vmatprep.mubr.msk.bf16.mxu0 %vm448_vm0, %v4361_v4  ;;  %v4368_v11 = vld [vmem:[%s4621_s19 + $0x48] sm:$0xff]   ;;  %v4369_v12 = vld [vmem:[%s4621_s19 + $0x50] sm:$0xff]   ;;  %v4370_v13 = vld [vmem:[%s4621_s19 + $0x58] sm:$0xff]  }
  0x15   : > { %v4371_v14 = vld [vmem:[%s4621_s19 + $0x60] sm:$0xff]   ;;  %v4372_v15 = vld [vmem:[%s4621_s19 + $0x68] sm:$0xff]   ;;  %v4373_v16 = vld [vmem:[%s4621_s19 + $0x70] sm:$0xff]   ;;  %4311 = vmatpush3.bf16.msra.mxu1 %v4691_v30 }
  0x16   : > { %v4374_v17 = vld [vmem:[%s4621_s19 + $0x78] sm:$0xff]   ;;  %4312 = vmatprep.subr.bf16.mxu1 %v4543_v21 }
  0x1b   : > { %4213 = vmatmul.mubr.msk.bf16.gmra.mrb[4].mxu0 %vm448_vm0, %v4362_v5 }
  0x1c   : > { %4216 = vmatprep.mubr.msk.bf16.mxu0 %vm448_vm0, %v4363_v6 }
  0x23   : > { %4217 = vmatmul.mubr.msk.bf16.gmra.mrb[8].mxu0 %vm448_vm0, %v4364_v7 }
  0x24   : > { %4220 = vmatprep.mubr.msk.bf16.mxu0 %vm448_vm0, %v4365_v8 }
  0x2b   : > { %4221 = vmatmul.mubr.msk.bf16.gmra.mrb[12].mxu0 %vm448_vm0, %v4366_v9 }
  0x2c   : > { %4224 = vmatprep.mubr.msk.bf16.mxu0 %vm448_vm0, %v4367_v10 }
  0x33   : > { %4225 = vmatmul.mubr.msk.bf16.gmra.mrb[16].mxu0 %vm448_vm0, %v4368_v11 }
  0x34   : > { %4228 = vmatprep.mubr.msk.bf16.mxu0 %vm448_vm0, %v4369_v12 }
  0x3b   : > { %4229 = vmatmul.mubr.msk.bf16.gmra.mrb[20].mxu0 %vm448_vm0, %v4370_v13 }
  0x3c   : > { %4232 = vmatprep.mubr.msk.bf16.mxu0 %vm448_vm0, %v4371_v14 }
  0x43   : > { %4233 = vmatmul.mubr.msk.bf16.gmra.mrb[24].mxu0 %vm448_vm0, %v4372_v15 }
  0x44   : > { %4236 = vmatprep.mubr.msk.bf16.mxu0 %vm448_vm0, %v4373_v16 }
  0x4b   : > { %4237 = vmatmul.mubr.msk.bf16.gmra.mrb[28].mxu0 %vm448_vm0, %v4374_v17 }
  0xe6   : > { %v4698_v32 = vpop.f32.mrb[0].mxu0 }
  0xe7   : > { %v4700_v33 = vpop.f32.mrb[1].mxu0  ;;  %v662_v39 = vsel %vm658_vm2, %v4698_v32, 0.0 }
  0xe8   : > { %v4702_v34 = vpop.f32.mrb[2].mxu0  ;;  %v659_v36 = vsel %vm658_vm2, %v4700_v33, 0.0 }
  0xe9   : > { %v4704_v35 = vpop.f32.mrb[3].mxu0  ;;  %v664_v41 = vsel %vm658_vm2, %v4702_v34, 0.0 }
  0xea   : > { %v660_v37 = vsel %vm658_vm2, %v4704_v35, 0.0 }
  0xeb   : > { %v661_v38 = vadd.f32 %v660_v37, %v659_v36 }
  0xed   : > { %v663_v40 = vadd.f32 %v662_v39, %v661_v38 }
  0xee   : > { %v4714_v42 = vpop.f32.mrb[4].mxu0 }
  0xef   : > { %v4716_v43 = vpop.f32.mrb[5].mxu0  ;;  %v665_v44 = vadd.f32 %v664_v41, %v663_v40  ;;  %v670_v51 = vsel %vm658_vm2, %v4714_v42, 0.0 }
  0xf0   : > { %v666_v45 = vsel %vm658_vm2, %v4716_v43, 0.0  ;;  %v4720_v46 = vpop.f32.mrb[6].mxu0 }
  0xf1   : > { %v667_v47 = vadd.f32 %v666_v45, %v665_v44  ;;  %v4722_v48 = vpop.f32.mrb[7].mxu0  ;;  %v672_v53 = vsel %vm658_vm2, %v4720_v46, 0.0 }
  0xf2   : > { %v668_v49 = vsel %vm658_vm2, %v4722_v48, 0.0 }
  0xf3   : > { %v669_v50 = vadd.f32 %v668_v49, %v667_v47 }
  0xf5   : > { %v671_v52 = vadd.f32 %v670_v51, %v669_v50 }
  0xf6   : > { %v4730_v54 = vpop.f32.mrb[8].mxu0 }
  0xf7   : > { %v4732_v55 = vpop.f32.mrb[9].mxu0  ;;  %v673_v56 = vadd.f32 %v672_v53, %v671_v52  ;;  %v678_v63 = vsel %vm658_vm2, %v4730_v54, 0.0 }
  0xf8   : > { %v674_v57 = vsel %vm658_vm2, %v4732_v55, 0.0  ;;  %v4736_v58 = vpop.f32.mrb[10].mxu0 }
  0xf9   : > { %v675_v59 = vadd.f32 %v674_v57, %v673_v56  ;;  %v4738_v60 = vpop.f32.mrb[11].mxu0  ;;  %v680_v1 = vsel %vm658_vm2, %v4736_v58, 0.0 }
  0xfa   : > { %v676_v61 = vsel %vm658_vm2, %v4738_v60, 0.0 }
  0xfb   : > { %v677_v62 = vadd.f32 %v676_v61, %v675_v59 }
  0xfd   : > { %v679_v0 = vadd.f32 %v678_v63, %v677_v62 }
  0xfe   : > { %v4746_v2 = vpop.f32.mrb[12].mxu0 }
  0xff   : > { %v4748_v3 = vpop.f32.mrb[13].mxu0  ;;  %v681_v4 = vadd.f32 %v680_v1, %v679_v0  ;;  %v686_v11 = vsel %vm658_vm2, %v4746_v2, 0.0 }
 0x100   : > { %v682_v5 = vsel %vm658_vm2, %v4748_v3, 0.0  ;;  %v4752_v6 = vpop.f32.mrb[14].mxu0 }
 0x101   : > { %v683_v7 = vadd.f32 %v682_v5, %v681_v4  ;;  %v4754_v8 = vpop.f32.mrb[15].mxu0  ;;  %v688_v13 = vsel %vm658_vm2, %v4752_v6, 0.0 }
 0x102   : > { %v684_v9 = vsel %vm658_vm2, %v4754_v8, 0.0 }
 0x103   : > { %v685_v10 = vadd.f32 %v684_v9, %v683_v7 }
 0x105   : > { %v687_v12 = vadd.f32 %v686_v11, %v685_v10 }
 0x106   : > { %v4762_v14 = vpop.f32.mrb[16].mxu0 }
 0x107   : > { %v4764_v15 = vpop.f32.mrb[17].mxu0  ;;  %v689_v16 = vadd.f32 %v688_v13, %v687_v12  ;;  %v694_v26 = vsel %vm658_vm2, %v4762_v14, 0.0 }
 0x108   : > { %v690_v17 = vsel %vm658_vm2, %v4764_v15, 0.0  ;;  %v4768_v18 = vpop.f32.mrb[18].mxu0 }
 0x109   : > { %v691_v19 = vadd.f32 %v690_v17, %v689_v16  ;;  %v4770_v22 = vpop.f32.mrb[19].mxu0  ;;  %v696_v29 = vsel %vm658_vm2, %v4768_v18, 0.0 }
 0x10a   : > { %v692_v23 = vsel %vm658_vm2, %v4770_v22, 0.0 }
 0x10b   : > { %v693_v25 = vadd.f32 %v692_v23, %v691_v19 }
 0x10d   : > { %v695_v28 = vadd.f32 %v694_v26, %v693_v25 }
 0x10e   : > { %v4778_v36 = vpop.f32.mrb[20].mxu0 }
 0x10f   : > { %v4780_v37 = vpop.f32.mrb[21].mxu0  ;;  %v697_v38 = vadd.f32 %v696_v29, %v695_v28  ;;  %v702_v49 = vsel %vm658_vm2, %v4778_v36, 0.0 }
 0x110   : > { %v698_v39 = vsel %vm658_vm2, %v4780_v37, 0.0  ;;  %v4784_v40 = vpop.f32.mrb[22].mxu0 }
 0x111   : > { %v699_v41 = vadd.f32 %v698_v39, %v697_v38  ;;  %v4786_v44 = vpop.f32.mrb[23].mxu0  ;;  %v704_v51 = vsel %vm658_vm2, %v4784_v40, 0.0 }
 0x112   : > { %v700_v45 = vsel %vm658_vm2, %v4786_v44, 0.0 }
 0x113   : > { %v701_v47 = vadd.f32 %v700_v45, %v699_v41  ;;  %v810_v45 = vld [vmem:[%s5956_s5] sm:$0xff] }
 0x115   : > { %v703_v50 = vadd.f32 %v702_v49, %v701_v47  ;;  %v811_v47 = vld [vmem:[%s5956_s5 + $0x8] sm:$0xff] }
 0x116   : > { %v4794_v52 = vpop.f32.mrb[24].mxu0 }
 0x117   : > { %v4796_v53 = vpop.f32.mrb[25].mxu0  ;;  %v705_v56 = vadd.f32 %v704_v51, %v703_v50  ;;  %v710_v1 = vsel %vm658_vm2, %v4794_v52, 0.0  ;;  %v4832_v50 = vpack.c.bf16 %v811_v47, %v810_v45 }
 0x118   : > { %v706_v57 = vsel %vm658_vm2, %v4796_v53, 0.0  ;;  %v4800_v59 = vpop.f32.mrb[26].mxu0 }
 0x119   : > { %v707_v61 = vadd.f32 %v706_v57, %v705_v56  ;;  %v4802_v62 = vpop.f32.mrb[27].mxu0  ;;  %v712_v5 = vsel %vm658_vm2, %v4800_v59, 0.0  ;;  %v812_v56 = vld [vmem:[%s5956_s5 + $0x10] sm:$0xff]  ;;  %v813_v57 = vld [vmem:[%s5956_s5 + $0x18] sm:$0xff] }
 0x11a   : > { %v708_v63 = vsel %vm658_vm2, %v4802_v62, 0.0 }
 0x11b   : > { %v709_v0 = vadd.f32 %v708_v63, %v707_v61  ;;  %v4845_v61 = vpack.c.bf16 %v813_v57, %v812_v56 }
 0x11d   : > { %v711_v4 = vadd.f32 %v710_v1, %v709_v0 }
 0x11e   : > { %v4810_v7 = vpop.f32.mrb[28].mxu0 }
 0x11f   : > { %v4812_v9 = vpop.f32.mrb[29].mxu0  ;;  %v713_v10 = vadd.f32 %v712_v5, %v711_v4  ;;  %v718_v23 = vsel %vm658_vm2, %v4810_v7, 0.0  ;;  %v887_v4 = vlaneseq }
 0x120   : > { %v714_v11 = vsel %vm658_vm2, %v4812_v9, 0.0  ;;  %v4816_v12 = vpop.f32.mrb[30].mxu0 }
 0x121   : > { %v715_v13 = vadd.f32 %v714_v11, %v713_v10  ;;  %v4818_v16 = vpop.f32.mrb[31].mxu0  ;;  %v720_v26 = vsel %vm658_vm2, %v4816_v12, 0.0  ;;  %v4860_v5 = vshrl.u32 %v887_v4, 7 }
 0x122   : > { %v716_v17 = vsel %vm658_vm2, %v4818_v16, 0.0 }
 0x123   : > { %v717_v19 = vadd.f32 %v716_v17, %v715_v13 }
 0x125   : > { %v719_v25 = vadd.f32 %v718_v23, %v717_v19 }
 0x127   : > { %v721_v28 = vadd.f32 %v720_v26, %v719_v25 }
 0x129   : > { %v722_v29 = vrot.slane %v721_v28, 4 }
 0x12b   : > { %v723_v38 = vadd.f32 %v722_v29, %v721_v28 }
 0x12d   : > { %v724_v39 = vrot.slane %v723_v38, 2 }
 0x12f   : > { %v725_v41 = vadd.f32 %v724_v39, %v723_v38 }
 0x131   : > { %v726_v49 = vrot.slane %v725_v41, 1 }
 0x133   : > { %v727_v51 = vadd.f32 %v726_v49, %v725_v41 }
 0x135   : > { %4257 = vmatmul.mubr.msk.f32.vlgmr.msra.gmra.mrb[0].mxu1 %vm658_vm2, %v727_v51 }
 0x136   : > { %4314 = vmatpush3.bf16.msra.mxu1 %v4832_v50  ;;  %4267 = vmatprep.mubr.msk.f32.mxu1 %vm4544_vm1, %v4545_v31 }
 0x137   : > { %4315 = vmatprep.subr.bf16.mxu1 %v4543_v21 }
 0x13a   : > { %4317 = vmatpush3.bf16.msra.mxu1 %v4845_v61 }
 0x13b   : > { %4318 = vmatprep.subr.bf16.mxu1 %v4543_v21 }
 0x208   : > { %v805_v63 = vpop.f32.mrb[0].mxu1 }
 0x209   : > { %v809_v0 = vmul.f32 0.001953125, %v805_v63  ;;  %v4258_v1 = vpop.f32.mrb[1].mxu1 }
 0x20b   : > { %4268 = vmatmul.mubr.msk.f32.vlgmr.msra.gmra.mrb[2].mxu1 %vm448_vm0, %v809_v0 }
 0x20c   : > { %4320 = vmatpush3.bf16.msra.mxu1 %v4661_v20  ;;  %4286 = vmatprep.mubr.msk.f32.mxu1 %vm4544_vm1, %v4545_v31  ;;  %v4863_v20 = vsub.s32 0, %v4860_v5 }
 0x20d   : > { %4321 = vmatprep.subr.bf16.mxu1 %v4543_v21 }
 0x210   : > { %4323 = vmatpush3.bf16.msra.mxu1 %v4672_v24 }
 0x211   : > { %4324 = vmatprep.subr.bf16.mxu1 %v4543_v21 }
 0x214   : > { %4326 = vmatpush3.bf16.msra.mxu1 %v4682_v27 }
 0x215   : > { %4327 = vmatprep.subr.bf16.mxu1 %v4543_v21 }
 0x218   : > { %4329 = vmatpush3.bf16.msra.mxu1 %v4691_v30 }
 0x219   : > { %4330 = vmatprep.subr.bf16.mxu1 %v4543_v21 }
 0x2de   : > { %v883_v10 = vpop.f32.mrb[2].mxu1 }
 0x2df   : > { %v890_v11 = vrot.slane %v883_v10, %v4863_v20  ;;  %v4269_v24 = vpop.f32.mrb[3].mxu1 }
 0x2e1   : > { %v4867_v13 = vsub.f32 %v4700_v33, %v890_v11  ;;  %v4870_v27 = vsub.f32 %v4704_v35, %v890_v11  ;;  %v4873_v30 = vsub.f32 %v4698_v32, %v890_v11  ;;  %v4876_v17 = vsub.f32 %v4702_v34, %v890_v11 }
 0x2e2   : > { %v4879_v19 = vsub.f32 %v4716_v43, %v890_v11  ;;  %v4882_v23 = vsub.f32 %v4722_v48, %v890_v11  ;;  %v4885_v25 = vsub.f32 %v4714_v42, %v890_v11  ;;  %v4888_v33 = vsub.f32 %v4720_v46, %v890_v11 }
 0x2e3   : > { %v4891_v35 = vsub.f32 %v4732_v55, %v890_v11  ;;  %v4894_v32 = vsub.f32 %v4738_v60, %v890_v11  ;;  %v4897_v34 = vsub.f32 %v4730_v54, %v890_v11  ;;  %v4900_v43 = vsub.f32 %v4736_v58, %v890_v11 }
 0x2e4   : > { %v4903_v48 = vsub.f32 %v4748_v3, %v890_v11  ;;  %v4906_v42 = vsub.f32 %v4754_v8, %v890_v11  ;;  %v4909_v46 = vsub.f32 %v4746_v2, %v890_v11  ;;  %v4912_v55 = vsub.f32 %v4752_v6, %v890_v11 }
 0x2e5   : > { %v4915_v60 = vsub.f32 %v4764_v15, %v890_v11  ;;  %v4918_v54 = vsub.f32 %v4770_v22, %v890_v11  ;;  %v4921_v58 = vsub.f32 %v4762_v14, %v890_v11  ;;  %v4924_v3 = vsub.f32 %v4768_v18, %v890_v11 }
 0x2e6   : > { %v4927_v8 = vsub.f32 %v4780_v37, %v890_v11  ;;  %v4930_v2 = vsub.f32 %v4786_v44, %v890_v11  ;;  %v4933_v6 = vsub.f32 %v4778_v36, %v890_v11  ;;  %v4936_v15 = vsub.f32 %v4784_v40, %v890_v11 }
 0x2e7   : > { %v4939_v22 = vsub.f32 %v4796_v53, %v890_v11  ;;  %v4942_v14 = vsub.f32 %v4802_v62, %v890_v11  ;;  %v4945_v18 = vsub.f32 %v4794_v52, %v890_v11  ;;  %v4948_v37 = vsub.f32 %v4800_v59, %v890_v11 }
 0x2e8   : > { %v4951_v44 = vsub.f32 %v4812_v9, %v890_v11  ;;  %v4954_v36 = vsub.f32 %v4818_v16, %v890_v11  ;;  %v4957_v40 = vsub.f32 %v4810_v7, %v890_v11  ;;  %v4960_v53 = vsub.f32 %v4816_v12, %v890_v11 }
 0x2e9   : > { %v923_v62 = vmul.f32 %v4867_v13, %v4867_v13  ;;  %v924_v52 = vmul.f32 %v4870_v27, %v4870_v27  ;;  %v925_v59 = vmul.f32 %v4873_v30, %v4873_v30  ;;  %v926_v9 = vmul.f32 %v4876_v17, %v4876_v17 }
 0x2ea   : > { %v927_v12 = vmul.f32 %v4879_v19, %v4879_v19  ;;  %v928_v38 = vmul.f32 %v4882_v23, %v4882_v23  ;;  %v929_v45 = vmul.f32 %v4885_v25, %v4885_v25  ;;  %v930_v51 = vmul.f32 %v4888_v33, %v4888_v33 }
 0x2eb   : > { %v955_v16 = vsel %vm658_vm2, %v923_v62, 0.0  ;;  %v956_v7 = vsel %vm658_vm2, %v924_v52, 0.0  ;;  %v958_v28 = vsel %vm658_vm2, %v925_v59, 0.0  ;;  %v960_v39 = vsel %vm658_vm2, %v926_v9, 0.0 }
 0x2ec   : > { %v957_v26 = vadd.f32 %v956_v7, %v955_v16  ;;  %v962_v47 = vsel %vm658_vm2, %v927_v12, 0.0  ;;  %v964_v56 = vsel %vm658_vm2, %v928_v38, 0.0  ;;  %v931_v63 = vmul.f32 %v4891_v35, %v4891_v35 }
 0x2ed   : > { %v966_v0 = vsel %vm658_vm2, %v929_v45, 0.0  ;;  %v932_v4 = vmul.f32 %v4894_v32, %v4894_v32  ;;  %v968_v10 = vsel %vm658_vm2, %v930_v51, 0.0  ;;  %v933_v24 = vmul.f32 %v4897_v34, %v4897_v34 }
 0x2ee   : > { %v959_v29 = vadd.f32 %v958_v28, %v957_v26  ;;  %v970_v62 = vsel %vm658_vm2, %v931_v63, 0.0  ;;  %v934_v59 = vmul.f32 %v4900_v43, %v4900_v43  ;;  %v935_v7 = vmul.f32 %v4903_v48, %v4903_v48 }
 0x2ef   : > { %v972_v9 = vsel %vm658_vm2, %v932_v4, 0.0  ;;  %v974_v26 = vsel %vm658_vm2, %v933_v24, 0.0  ;;  %v936_v28 = vmul.f32 %v4906_v42, %v4906_v42 }
 0x2f0   : > { %v961_v41 = vadd.f32 %v960_v39, %v959_v29  ;;  %v976_v29 = vsel %vm658_vm2, %v934_v59, 0.0  ;;  %v937_v39 = vmul.f32 %v4909_v46, %v4909_v46 }
 0x2f2   : > { %v963_v49 = vadd.f32 %v962_v47, %v961_v41  ;;  %v978_v41 = vsel %vm658_vm2, %v935_v7, 0.0  ;;  %v938_v47 = vmul.f32 %v4912_v55, %v4912_v55 }
 0x2f4   : > { %v965_v57 = vadd.f32 %v964_v56, %v963_v49  ;;  %v980_v49 = vsel %vm658_vm2, %v936_v28, 0.0  ;;  %v939_v56 = vmul.f32 %v4915_v60, %v4915_v60 }
 0x2f6   : > { %v967_v1 = vadd.f32 %v966_v0, %v965_v57  ;;  %v982_v57 = vsel %vm658_vm2, %v937_v39, 0.0  ;;  %v940_v0 = vmul.f32 %v4918_v54, %v4918_v54 }
 0x2f8   : > { %v969_v11 = vadd.f32 %v968_v10, %v967_v1  ;;  %v984_v1 = vsel %vm658_vm2, %v938_v47, 0.0  ;;  %v941_v10 = vmul.f32 %v4921_v58, %v4921_v58 }
 0x2fa   : > { %v971_v52 = vadd.f32 %v970_v62, %v969_v11  ;;  %v986_v11 = vsel %vm658_vm2, %v939_v56, 0.0  ;;  %v942_v62 = vmul.f32 %v4924_v3, %v4924_v3 }
 0x2fc   : > { %v973_v16 = vadd.f32 %v972_v9, %v971_v52  ;;  %v988_v52 = vsel %vm658_vm2, %v940_v0, 0.0  ;;  %v943_v9 = vmul.f32 %v4927_v8, %v4927_v8 }
 0x2fe   : > { %v975_v12 = vadd.f32 %v974_v26, %v973_v16  ;;  %v990_v16 = vsel %vm658_vm2, %v941_v10, 0.0  ;;  %v944_v26 = vmul.f32 %v4930_v2, %v4930_v2 }
 0x300   : > { %v977_v38 = vadd.f32 %v976_v29, %v975_v12  ;;  %v992_v12 = vsel %vm658_vm2, %v942_v62, 0.0  ;;  %v945_v29 = vmul.f32 %v4933_v6, %v4933_v6 }
 0x302   : > { %v979_v45 = vadd.f32 %v978_v41, %v977_v38  ;;  %v994_v38 = vsel %vm658_vm2, %v943_v9, 0.0  ;;  %v946_v41 = vmul.f32 %v4936_v15, %v4936_v15 }
 0x304   : > { %v981_v51 = vadd.f32 %v980_v49, %v979_v45  ;;  %v996_v45 = vsel %vm658_vm2, %v944_v26, 0.0  ;;  %v947_v49 = vmul.f32 %v4939_v22, %v4939_v22 }
 0x306   : > { %v983_v63 = vadd.f32 %v982_v57, %v981_v51  ;;  %v998_v51 = vsel %vm658_vm2, %v945_v29, 0.0  ;;  %v948_v57 = vmul.f32 %v4942_v14, %v4942_v14 }
 0x308   : > { %v985_v4 = vadd.f32 %v984_v1, %v983_v63  ;;  %v1000_v63 = vsel %vm658_vm2, %v946_v41, 0.0  ;;  %v949_v1 = vmul.f32 %v4945_v18, %v4945_v18 }
 0x30a   : > { %v987_v24 = vadd.f32 %v986_v11, %v985_v4  ;;  %v1002_v4 = vsel %vm658_vm2, %v947_v49, 0.0  ;;  %v950_v11 = vmul.f32 %v4948_v37, %v4948_v37 }
 0x30c   : > { %v989_v59 = vadd.f32 %v988_v52, %v987_v24  ;;  %v1004_v24 = vsel %vm658_vm2, %v948_v57, 0.0  ;;  %v951_v52 = vmul.f32 %v4951_v44, %v4951_v44 }
 0x30e   : > { %v991_v7 = vadd.f32 %v990_v16, %v989_v59  ;;  %v1006_v59 = vsel %vm658_vm2, %v949_v1, 0.0  ;;  %v952_v16 = vmul.f32 %v4954_v36, %v4954_v36 }
 0x310   : > { %v993_v28 = vadd.f32 %v992_v12, %v991_v7  ;;  %v1008_v7 = vsel %vm658_vm2, %v950_v11, 0.0  ;;  %v953_v12 = vmul.f32 %v4957_v40, %v4957_v40 }
 0x312   : > { %v995_v39 = vadd.f32 %v994_v38, %v993_v28  ;;  %v1010_v28 = vsel %vm658_vm2, %v951_v52, 0.0  ;;  %v954_v38 = vmul.f32 %v4960_v53, %v4960_v53 }
 0x314   : > { %v997_v47 = vadd.f32 %v996_v45, %v995_v39  ;;  %v1012_v39 = vsel %vm658_vm2, %v952_v16, 0.0  ;;  %v1014_v45 = vsel %vm658_vm2, %v953_v12, 0.0  ;;  %v1016_v49 = vsel %vm658_vm2, %v954_v38, 0.0  ;;  %v1431_v12 = vld [vmem:[%s5957_s6 + $0x148] sm:$0xff]  ;;  %v1390_v38 = vld [vmem:[%s5957_s6] sm:$0xff] }
 0x316   : > { %v999_v56 = vadd.f32 %v998_v51, %v997_v47 }
 0x318   : > { %v1001_v0 = vadd.f32 %v1000_v63, %v999_v56 }
 0x31a   : > { %v1003_v10 = vadd.f32 %v1002_v4, %v1001_v0 }
 0x31c   : > { %v1005_v62 = vadd.f32 %v1004_v24, %v1003_v10 }
 0x31e   : > { %v1007_v9 = vadd.f32 %v1006_v59, %v1005_v62  ;;  %v1391_v59 = vld [vmem:[%s5957_s6 + $0x8] sm:$0xff] }
 0x320   : > { %v1009_v26 = vadd.f32 %v1008_v7, %v1007_v9  ;;  %v1415_v9 = vld [vmem:[%s5957_s6 + $0xc8] sm:$0xff] }
 0x322   : > { %v1011_v29 = vadd.f32 %v1010_v28, %v1009_v26  ;;  %v1423_v26 = vld [vmem:[%s5957_s6 + $0x108] sm:$0xff] }
 0x323   : > { %v3809_v28 = vcombine.low %v1423_v26, %v1431_v12 }
 0x324   : > { %v1013_v41 = vadd.f32 %v1012_v39, %v1011_v29  ;;  %v3810_v29 = vcombine.high %v1423_v26, %v1431_v12  ;;  %v1398_v39 = vld [vmem:[%s5957_s6 + $0x40] sm:$0xff] }
 0x326   : > { %v1015_v47 = vadd.f32 %v1014_v45, %v1013_v41  ;;  %v3776_v41 = vcombine.high %v1390_v38, %v1398_v39  ;;  %v3775_v45 = vcombine.low %v1390_v38, %v1398_v39 }
 0x328   : > { %v1017_v51 = vadd.f32 %v1016_v49, %v1015_v47  ;;  %v1406_v47 = vld [vmem:[%s5957_s6 + $0x80] sm:$0xff] }
 0x329   : > { %v1414_v49 = vld [vmem:[%s5957_s6 + $0xc0] sm:$0xff] }
 0x32a   : > { %v1018_v56 = vrot.slane %v1017_v51, 4 }
 0x32c   : > { %v1019_v57 = vadd.f32 %v1018_v56, %v1017_v51  ;;  %v3792_v51 = vcombine.high %v1406_v47, %v1414_v49  ;;  %v3791_v56 = vcombine.low %v1406_v47, %v1414_v49  ;;  %v5153_v47 = vld [vmem:[%s5953_s2] ss:$0 sm:$0xff] }
 0x32e   : > { %v1020_v63 = vrot.slane %v1019_v57, 2 }
 0x330   : > { %v1021_v0 = vadd.f32 %v1020_v63, %v1019_v57  ;;  %v1422_v57 = vld [vmem:[%s5957_s6 + $0x100] sm:$0xff] }
 0x331   : > { %v1430_v63 = vld [vmem:[%s5957_s6 + $0x140] sm:$0xff] }
 0x332   : > { %v1022_v1 = vrot.slane %v1021_v0, 1 }
 0x334   : > { %v1023_v4 = vadd.f32 %v1022_v1, %v1021_v0  ;;  %v3808_v0 = vcombine.high %v1422_v57, %v1430_v63  ;;  %v3807_v1 = vcombine.low %v1422_v57, %v1430_v63  ;;  %v5162_v57 = vld [vmem:[%s5954_s3] ss:$0 sm:$0xff] }
 0x336   : > { %4287 = vmatmul.mubr.msk.f32.vlgmr.msra.gmra.mrb[4].mxu1 %vm658_vm2, %v1023_v4  ;;  %v1439_v4 = vld [vmem:[%s5957_s6 + $0x188] sm:$0xff] }
 0x337   : > { %4332 = vmatpush3.bf16.msra.mxu1 %v4832_v50  ;;  %4297 = vmatprep.mubr.msk.f32.mxu1 %vm4544_vm1, %v4545_v31  ;;  %v1399_v31 = vld [vmem:[%s5957_s6 + $0x48] sm:$0xff] }
 0x338   : > { %4333 = vmatprep.subr.bf16.mxu1 %v4543_v21  ;;  %v3777_v50 = vcombine.low %v1391_v59, %v1399_v31  ;;  %v3778_v21 = vcombine.high %v1391_v59, %v1399_v31 }
 0x33a   : > { %1818 = vmatprep.subr.bf16.mxu0 %v3778_v21  ;;  %v5121_v21 = vld [vmem:[%s5957_s6 + $0x50] sm:$0xff] }
 0x33b   : > { %4335 = vmatpush3.bf16.msra.mxu1 %v4845_v61  ;;  %1819 = vmatpush1.bf16.msra.mxu0 %v3777_v50  ;;  %v1407_v61 = vld [vmem:[%s5957_s6 + $0x88] sm:$0xff]  ;;  %v5116_v50 = vld [vmem:[%s5957_s6 + $0x10] sm:$0xff] }
 0x33c   : > { %v3793_v16 = vcombine.low %v1407_v61, %v1415_v9  ;;  %v3794_v7 = vcombine.high %v1407_v61, %v1415_v9  ;;  %1777 = vmatprep.subr.bf16.mxu1 %v3776_v41  ;;  %v5126_v61 = vld [vmem:[%s5957_s6 + $0x18] sm:$0xff]  ;;  %v3780_v9 = vcombine.high %v5116_v50, %v5121_v21 }
 0x33e   : > { %1820 = vmatprep.subr.bf16.mxu0 %v3794_v7  ;;  %v3779_v7 = vcombine.low %v5116_v50, %v5121_v21  ;;  %v1441_v50 = vld [vmem:[%s5957_s6 + $0x198] sm:$0xff] }
 0x33f   : > { %1821 = vmatpush1.bf16.msra.mxu0 %v3793_v16  ;;  %v5133_v16 = vld [vmem:[%s5957_s6 + $0x58] sm:$0xff] }
 0x340   : > { %1822 = vmatprep.subr.bf16.mxu0 %v3810_v29  ;;  %v3781_v26 = vcombine.low %v5126_v61, %v5133_v16  ;;  %v3782_v12 = vcombine.high %v5126_v61, %v5133_v16  ;;  %v1449_v21 = vld [vmem:[%s5957_s6 + $0x1d8] sm:$0xff] }
 0x343   : > { %1823 = vmatpush1.bf16.msra.mxu0 %v3809_v28  ;;  %v4546_v28 = vmov 0  }
 0x344   : > { %1850 = vmatprep.mubr.bf16.mxu0 %v4546_v28 }
 0x409   : > { %v1093_v10 = vpop.f32.mrb[4].mxu1 }
 0x40a   : > { %v1097_v11 = vmul.f32 0.001953125, %v1093_v10  ;;  %v4288_v24 = vpop.f32.mrb[5].mxu1  ;;  %v1447_v10 = vld [vmem:[%s5957_s6 + $0x1c8] sm:$0xff] }
 0x40b   : > { %v3826_v24 = vcombine.high %v1439_v4, %v1447_v10 }
 0x40c   : > { %v1098_v62 = vadd.f32 1e-05, %v1097_v11  ;;  %v1438_v11 = vld [vmem:[%s5957_s6 + $0x180] sm:$0xff] }
 0x40d   : > { %1824 = vmatprep.subr.bf16.mxu0 %v3826_v24 }
 0x40e   : > { %4375 = vrsqrt.f32 %v1098_v62  ;;  %v1446_v62 = vld [vmem:[%s5957_s6 + $0x1c0] sm:$0xff] }
 0x40f   : > { %v3823_v59 = vcombine.low %v1438_v11, %v1446_v62  ;;  %v3824_v31 = vcombine.high %v1438_v11, %v1446_v62 }
 0x418   : > { %v4376_v52 = vpop.eup %4375 }
 0x419   : > { %4298 = vmatmul.mubr.msk.f32.vlgmr.msra.gmra.mrb[6].mxu1 %vm448_vm0, %v4376_v52  ;;  %v3825_v52 = vcombine.low %v1439_v4, %v1447_v10 }
 0x41a   : > { %1778 = vmatpush1.bf16.msra.mxu1 %v3775_v45  ;;  %1809 = vmatprep.mubr.bf16.mxu1 %v4546_v28 }
 0x41b   : > { %1779 = vmatprep.subr.bf16.mxu1 %v3792_v51  ;;  %1825 = vmatpush1.bf16.msra.mxu0 %v3825_v52 }
 0x41c   : > { %1900 = vmatprep.subr.bf16.mxu0 %v3782_v12 }
 0x41e   : > { %1780 = vmatpush1.bf16.msra.mxu1 %v3791_v56 }
 0x41f   : > { %1781 = vmatprep.subr.bf16.mxu1 %v3808_v0 }
 0x422   : > { %1782 = vmatpush1.bf16.msra.mxu1 %v3807_v1 }
 0x423   : > { %1783 = vmatprep.subr.bf16.mxu1 %v3824_v31 }
 0x426   : > { %1784 = vmatpush1.bf16.msra.mxu1 %v3823_v59 }
 0x427   : > { %1859 = vmatprep.subr.bf16.mxu1 %v3780_v9 }
 0x4ec   : > { %v1169_v29 = vpop.f32.mrb[6].mxu1 }
 0x4ed   : > { %v4299_v38 = vpop.f32.mrb[7].mxu1  ;;  %v5144_v39 = vrot.slane %v1169_v29, %v4863_v20 }
 0x4ef   : > { %v1177_v41 = vmul.f32 %v5144_v39, %v4867_v13  ;;  %v1178_v45 = vmul.f32 %v5144_v39, %v4870_v27  ;;  %v1179_v49 = vmul.f32 %v5144_v39, %v4873_v30  ;;  %v1180_v13 = vmul.f32 %v5144_v39, %v4876_v17 }
 0x4f0   : > { %v1181_v27 = vmul.f32 %v5144_v39, %v4879_v19  ;;  %v1182_v1 = vmul.f32 %v5144_v39, %v4882_v23  ;;  %v1183_v10 = vmul.f32 %v5144_v39, %v4885_v25  ;;  %v1184_v62 = vmul.f32 %v5144_v39, %v4888_v33 }
 0x4f1   : > { %v1216_v51 = vmul.f32 %v5153_v47, %v1177_v41  ;;  %v1217_v56 = vmul.f32 %v5153_v47, %v1178_v45  ;;  %v1218_v63 = vmul.f32 %v5153_v47, %v1179_v49  ;;  %v1219_v4 = vmul.f32 %v5153_v47, %v1180_v13 }
 0x4f2   : > { %v1220_v11 = vmul.f32 %v5153_v47, %v1181_v27  ;;  %v1221_v52 = vmul.f32 %v5153_v47, %v1182_v1  ;;  %v1185_v23 = vmul.f32 %v5144_v39, %v4891_v35  ;;  %v1222_v31 = vmul.f32 %v5153_v47, %v1183_v10 }
 0x4f3   : > { %v1255_v0 = vadd.f32 %v5162_v57, %v1216_v51  ;;  %v1256_v30 = vadd.f32 %v5162_v57, %v1217_v56  ;;  %v1257_v17 = vadd.f32 %v5162_v57, %v1218_v63  ;;  %v1258_v59 = vadd.f32 %v5162_v57, %v1219_v4 }
 0x4f4   : > { %v1259_v25 = vadd.f32 %v5162_v57, %v1220_v11  ;;  %v1186_v38 = vmul.f32 %v5144_v39, %v4894_v32  ;;  %v1223_v33 = vmul.f32 %v5153_v47, %v1184_v62  ;;  %v1260_v41 = vadd.f32 %v5162_v57, %v1221_v52 }
 0x4f5   : > { %v1287_v24 = vmax.f32 %v1255_v0, 0.0  ;;  %v1288_v19 = vmax.f32 %v1256_v30, 0.0  ;;  %v1289_v9 = vmax.f32 %v1257_v17, 0.0  ;;  %v1290_v45 = vmax.f32 %v1258_v59, 0.0 }
 0x4f6   : > { %v1187_v35 = vmul.f32 %v5144_v39, %v4897_v34  ;;  %v1224_v51 = vmul.f32 %v5153_v47, %v1185_v23  ;;  %v1261_v56 = vadd.f32 %v5162_v57, %v1222_v31  ;;  %v1291_v13 = vmax.f32 %v1259_v25, 0.0 }
 0x4f7   : > { %v1319_v12 = vsel %vm658_vm2, %v1287_v24, 0.0  ;;  %v1320_v29 = vsel %vm658_vm2, %v1288_v19, 0.0  ;;  %v1322_v27 = vsel %vm658_vm2, %v1289_v9, 0.0  ;;  %v1188_v63 = vmul.f32 %v5144_v39, %v4900_v43 }
 0x4f8   : > { %v1321_v49 = vadd.f32 %v1320_v29, %v1319_v12  ;;  %v1225_v0 = vmul.f32 %v5153_v47, %v1186_v38  ;;  %v1262_v30 = vadd.f32 %v5162_v57, %v1223_v33  ;;  %v1292_v1 = vmax.f32 %v1260_v41, 0.0 }
 0x4f9   : > { %v1324_v4 = vsel %vm658_vm2, %v1290_v45, 0.0  ;;  %v1189_v34 = vmul.f32 %v5144_v39, %v4903_v48  ;;  %v1226_v11 = vmul.f32 %v5153_v47, %v1187_v35  ;;  %v1263_v17 = vadd.f32 %v5162_v57, %v1224_v51 }
 0x4fa   : > { %v1323_v32 = vadd.f32 %v1322_v27, %v1321_v49  ;;  %v1293_v24 = vmax.f32 %v1261_v56, 0.0  ;;  %v1326_v19 = vsel %vm658_vm2, %v1291_v13, 0.0  ;;  %v1190_v43 = vmul.f32 %v5144_v39, %v4906_v42 }
 0x4fb   : > { %v1227_v52 = vmul.f32 %v5153_v47, %v1188_v63  ;;  %v1264_v59 = vadd.f32 %v5162_v57, %v1225_v0  ;;  %v1294_v23 = vmax.f32 %v1262_v30, 0.0  ;;  %v1328_v31 = vsel %vm658_vm2, %v1292_v1, 0.0 }
 0x4fc   : > { %v1325_v10 = vadd.f32 %v1324_v4, %v1323_v32  ;;  %v1191_v48 = vmul.f32 %v5144_v39, %v4909_v46  ;;  %v1228_v9 = vmul.f32 %v5153_v47, %v1189_v34  ;;  %v1265_v12 = vadd.f32 %v5162_v57, %v1226_v11 }
 0x4fd   : > { %v1295_v29 = vmax.f32 %v1263_v17, 0.0  ;;  %v1330_v38 = vsel %vm658_vm2, %v1293_v24, 0.0  ;;  %v1192_v42 = vmul.f32 %v5144_v39, %v4912_v55  ;;  %v1229_v41 = vmul.f32 %v5153_v47, %v1190_v43 }
 0x4fe   : > { %v1327_v62 = vadd.f32 %v1326_v19, %v1325_v10  ;;  %v1266_v45 = vadd.f32 %v5162_v57, %v1227_v52  ;;  %v1296_v35 = vmax.f32 %v1264_v59, 0.0  ;;  %v1332_v49 = vsel %vm658_vm2, %v1294_v23, 0.0 }
 0x4ff   : > { %v1193_v46 = vmul.f32 %v5144_v39, %v4915_v60  ;;  %v1230_v56 = vmul.f32 %v5153_v47, %v1191_v48  ;;  %v1267_v13 = vadd.f32 %v5162_v57, %v1228_v9  ;;  %v1297_v27 = vmax.f32 %v1265_v12, 0.0 }
 0x500   : > { %v1329_v25 = vadd.f32 %v1328_v31, %v1327_v62  ;;  %v1334_v63 = vsel %vm658_vm2, %v1295_v29, 0.0  ;;  %v1194_v55 = vmul.f32 %v5144_v39, %v4918_v54  ;;  %v1231_v0 = vmul.f32 %v5153_v47, %v1192_v42 }
 0x501   : > { %v1268_v30 = vadd.f32 %v5162_v57, %v1229_v41  ;;  %v1298_v1 = vmax.f32 %v1266_v45, 0.0  ;;  %v1336_v4 = vsel %vm658_vm2, %v1296_v35, 0.0  ;;  %v1195_v60 = vmul.f32 %v5144_v39, %v4921_v58 }
 0x502   : > { %v1331_v33 = vadd.f32 %v1330_v38, %v1329_v25  ;;  %v1232_v10 = vmul.f32 %v5153_v47, %v1193_v46  ;;  %v1269_v11 = vadd.f32 %v5162_v57, %v1230_v56  ;;  %v1299_v17 = vmax.f32 %v1267_v13, 0.0 }
 0x503   : > { %v1338_v24 = vsel %vm658_vm2, %v1297_v27, 0.0  ;;  %v1196_v54 = vmul.f32 %v5144_v39, %v4924_v3  ;;  %v1233_v43 = vmul.f32 %v5153_v47, %v1194_v55  ;;  %v1270_v62 = vadd.f32 %v5162_v57, %v1231_v0 }
 0x504   : > { %v1333_v51 = vadd.f32 %v1332_v49, %v1331_v33  ;;  %v1300_v52 = vmax.f32 %v1268_v30, 0.0  ;;  %v1340_v59 = vsel %vm658_vm2, %v1298_v1, 0.0  ;;  %v1197_v58 = vmul.f32 %v5144_v39, %v4927_v8 }
 0x505   : > { %v1234_v31 = vmul.f32 %v5153_v47, %v1195_v60  ;;  %v1271_v48 = vadd.f32 %v5162_v57, %v1232_v10  ;;  %v1301_v25 = vmax.f32 %v1269_v11, 0.0  ;;  %v1342_v9 = vsel %vm658_vm2, %v1299_v17, 0.0 }
 0x506   : > { %v1335_v32 = vadd.f32 %v1334_v63, %v1333_v51  ;;  %v1198_v3 = vmul.f32 %v5144_v39, %v4930_v2  ;;  %v1235_v29 = vmul.f32 %v5153_v47, %v1196_v54  ;;  %v1272_v38 = vadd.f32 %v5162_v57, %v1233_v43 }
 0x507   : > { %v1302_v42 = vmax.f32 %v1270_v62, 0.0  ;;  %v1344_v33 = vsel %vm658_vm2, %v1300_v52, 0.0  ;;  %v1199_v8 = vmul.f32 %v5144_v39, %v4933_v6  ;;  %v1236_v45 = vmul.f32 %v5153_v47, %v1197_v58 }
 0x508   : > { %v1337_v34 = vadd.f32 %v1336_v4, %v1335_v32  ;;  %v1273_v35 = vadd.f32 %v5162_v57, %v1234_v31  ;;  %v1303_v49 = vmax.f32 %v1271_v48, 0.0  ;;  %v1346_v46 = vsel %vm658_vm2, %v1301_v25, 0.0 }
 0x509   : > { %v1200_v2 = vmul.f32 %v5144_v39, %v4936_v15  ;;  %v1237_v56 = vmul.f32 %v5153_v47, %v1198_v3  ;;  %v1274_v13 = vadd.f32 %v5162_v57, %v1235_v29  ;;  %v1304_v27 = vmax.f32 %v1272_v38, 0.0 }
 0x50a   : > { %v1339_v19 = vadd.f32 %v1338_v24, %v1337_v34  ;;  %v1348_v63 = vsel %vm658_vm2, %v1302_v42, 0.0  ;;  %v1201_v6 = vmul.f32 %v5144_v39, %v4939_v22  ;;  %v1238_v32 = vmul.f32 %v5153_v47, %v1199_v8 }
 0x50b   : > { %v1275_v0 = vadd.f32 %v5162_v57, %v1236_v45  ;;  %v1305_v30 = vmax.f32 %v1273_v35, 0.0  ;;  %v1350_v1 = vsel %vm658_vm2, %v1303_v49, 0.0  ;;  %v1202_v15 = vmul.f32 %v5144_v39, %v4942_v14 }
 0x50c   : > { %v1341_v23 = vadd.f32 %v1340_v59, %v1339_v19  ;;  %v1239_v60 = vmul.f32 %v5153_v47, %v1200_v2  ;;  %v1276_v34 = vadd.f32 %v5162_v57, %v1237_v56  ;;  %v1306_v10 = vmax.f32 %v1274_v13, 0.0 }
 0x50d   : > { %v1352_v11 = vsel %vm658_vm2, %v1304_v27, 0.0  ;;  %v1203_v22 = vmul.f32 %v5144_v39, %v4945_v18  ;;  %v1240_v24 = vmul.f32 %v5153_v47, %v1201_v6  ;;  %v1277_v54 = vadd.f32 %v5162_v57, %v1238_v32 }
 0x50e   : > { %v1343_v12 = vadd.f32 %v1342_v9, %v1341_v23  ;;  %v1307_v19 = vmax.f32 %v1275_v0, 0.0  ;;  %v1354_v43 = vsel %vm658_vm2, %v1305_v30, 0.0  ;;  %v1204_v14 = vmul.f32 %v5144_v39, %v4948_v37 }
 0x50f   : > { %v1241_v52 = vmul.f32 %v5153_v47, %v1202_v15  ;;  %v1278_v59 = vadd.f32 %v5162_v57, %v1239_v60  ;;  %v1308_v58 = vmax.f32 %v1276_v34, 0.0  ;;  %v1356_v23 = vsel %vm658_vm2, %v1306_v10, 0.0 }
 0x510   : > { %v1345_v41 = vadd.f32 %v1344_v33, %v1343_v12  ;;  %v1205_v18 = vmul.f32 %v5144_v39, %v4951_v44  ;;  %v1242_v48 = vmul.f32 %v5153_v47, %v1203_v22  ;;  %v1279_v25 = vadd.f32 %v5162_v57, %v1240_v24 }
 0x511   : > { %v1309_v9 = vmax.f32 %v1277_v54, 0.0  ;;  %v1358_v3 = vsel %vm658_vm2, %v1307_v19, 0.0  ;;  %v1206_v37 = vmul.f32 %v5144_v39, %v4954_v36  ;;  %v1243_v29 = vmul.f32 %v5153_v47, %v1204_v14 }
 0x512   : > { %v1347_v51 = vadd.f32 %v1346_v46, %v1345_v41  ;;  %v1280_v38 = vadd.f32 %v5162_v57, %v1241_v52  ;;  %v1310_v42 = vmax.f32 %v1278_v59, 0.0  ;;  %v1360_v33 = vsel %vm658_vm2, %v1308_v58, 0.0 }
 0x513   : > { %v1207_v44 = vmul.f32 %v5144_v39, %v4957_v40  ;;  %v1244_v41 = vmul.f32 %v5153_v47, %v1205_v18  ;;  %v1281_v45 = vadd.f32 %v5162_v57, %v1242_v48  ;;  %v1311_v35 = vmax.f32 %v1279_v25, 0.0 }
 0x514   : > { %v1349_v55 = vadd.f32 %v1348_v63, %v1347_v51  ;;  %v1362_v49 = vsel %vm658_vm2, %v1309_v9, 0.0  ;;  %v1208_v36 = vmul.f32 %v5144_v39, %v4960_v53  ;;  %v1245_v2 = vmul.f32 %v5153_v47, %v1206_v37  ;;  %v1408_v9 = vld [vmem:[%s5957_s6 + $0x90] sm:$0xff]  ;;  %v1409_v37 = vld [vmem:[%s5957_s6 + $0x98] sm:$0xff] }
 0x515   : > { %v1282_v51 = vadd.f32 %v5162_v57, %v1243_v29  ;;  %v1312_v56 = vmax.f32 %v1280_v38, 0.0  ;;  %v1364_v13 = vsel %vm658_vm2, %v1310_v42, 0.0  ;;  %v1246_v27 = vmul.f32 %v5153_v47, %v1207_v44  ;;  %v1424_v44 = vld [vmem:[%s5957_s6 + $0x110] sm:$0xff] }
 0x516   : > { %v1351_v4 = vadd.f32 %v1350_v1, %v1349_v55  ;;  %v1283_v63 = vadd.f32 %v5162_v57, %v1244_v41  ;;  %v1313_v6 = vmax.f32 %v1281_v45, 0.0  ;;  %v1366_v55 = vsel %vm658_vm2, %v1311_v35, 0.0  ;;  %v1425_v41 = vld [vmem:[%s5957_s6 + $0x118] sm:$0xff] }
 0x517   : > { %v1247_v0 = vmul.f32 %v5153_v47, %v1208_v36  ;;  %v1284_v53 = vadd.f32 %v5162_v57, %v1245_v2  ;;  %v1314_v39 = vmax.f32 %v1282_v51, 0.0  ;;  %v1368_v30 = vsel %vm658_vm2, %v1312_v56, 0.0  ;;  %v1433_v45 = vld [vmem:[%s5957_s6 + $0x158] sm:$0xff]  ;;  %v1440_v2 = vld [vmem:[%s5957_s6 + $0x190] sm:$0xff]  ;;  %v1394_v56 = vld [vmem:[%s5957_s6 + $0x20] sm:$0xff] }
 0x518   : > { %v1353_v17 = vadd.f32 %v1352_v11, %v1351_v4  ;;  %v1285_v15 = vadd.f32 %v5162_v57, %v1246_v27  ;;  %v1315_v4 = vmax.f32 %v1283_v63, 0.0  ;;  %v1370_v60 = vsel %vm658_vm2, %v1313_v6, 0.0  ;;  %v1448_v51 = vld [vmem:[%s5957_s6 + $0x1d0] sm:$0xff]  ;;  %v1403_v27 = vld [vmem:[%s5957_s6 + $0x68] sm:$0xff] }
 0x519   : > { %v1286_v10 = vadd.f32 %v5162_v57, %v1247_v0  ;;  %v1316_v11 = vmax.f32 %v1284_v53, 0.0  ;;  %v1372_v22 = vsel %vm658_vm2, %v1314_v39, 0.0  ;;  %v3813_v16 = vcombine.low %v1425_v41, %v1433_v45  ;;  %v1410_v0 = vld [vmem:[%s5957_s6 + $0xa0] sm:$0xff]  ;;  %v1411_v39 = vld [vmem:[%s5957_s6 + $0xa8] sm:$0xff] }
 0x51a   : > { %v1355_v62 = vadd.f32 %v1354_v43, %v1353_v17  ;;  %v1317_v24 = vmax.f32 %v1285_v15, 0.0  ;;  %v1374_v47 = vsel %vm658_vm2, %v1315_v4, 0.0  ;;  %v3827_v63 = vcombine.low %v1440_v2, %v1448_v51  ;;  %v1418_v53 = vld [vmem:[%s5957_s6 + $0xe0] sm:$0xff] }
 0x51b   : > { %v1318_v19 = vmax.f32 %v1286_v10, 0.0  ;;  %v1376_v43 = vsel %vm658_vm2, %v1316_v11, 0.0  ;;  %v3829_v6 = vcombine.low %v1441_v50, %v1449_v21  ;;  %v3800_v4 = vcombine.high %v1410_v0, %v1418_v53  ;;  %v1434_v10 = vld [vmem:[%s5957_s6 + $0x160] sm:$0xff]  ;;  %v1427_v11 = vld [vmem:[%s5957_s6 + $0x128] sm:$0xff] }
 0x51c   : > { %v1357_v31 = vadd.f32 %v1356_v23, %v1355_v62  ;;  %v1378_v62 = vsel %vm658_vm2, %v1317_v24, 0.0 }
 0x51d   : > { %v1380_v59 = vsel %vm658_vm2, %v1318_v19, 0.0  ;;  %v1442_v19 = vld [vmem:[%s5957_s6 + $0x1a0] sm:$0xff] }
 0x51e   : > { %v1359_v12 = vadd.f32 %v1358_v3, %v1357_v31  ;;  %v1416_v3 = vld [vmem:[%s5957_s6 + $0xd0] sm:$0xff] }
 0x51f   : > { %v3796_v42 = vcombine.high %v1408_v9, %v1416_v3  ;;  %v3795_v35 = vcombine.low %v1408_v9, %v1416_v3 }
 0x520   : > { %v1361_v8 = vadd.f32 %v1360_v33, %v1359_v12  ;;  %v1417_v12 = vld [vmem:[%s5957_s6 + $0xd8] sm:$0xff] }
 0x521   : > { %v3798_v33 = vcombine.high %v1409_v37, %v1417_v12 }
 0x522   : > { %v1363_v46 = vadd.f32 %v1362_v49, %v1361_v8  ;;  %v1432_v8 = vld [vmem:[%s5957_s6 + $0x150] sm:$0xff]  ;;  %v3797_v49 = vcombine.low %v1409_v37, %v1417_v12 }
 0x523   : > { %v3812_v36 = vcombine.high %v1424_v44, %v1432_v8  ;;  %v3811_v61 = vcombine.low %v1424_v44, %v1432_v8  ;;  %v1412_v12 = vld [vmem:[%s5957_s6 + $0xb0] sm:$0xff] }
 0x524   : > { %v1365_v40 = vadd.f32 %v1364_v13, %v1363_v46  ;;  %v3814_v46 = vcombine.high %v1425_v41, %v1433_v45  ;;  %v1402_v13 = vld [vmem:[%s5957_s6 + $0x60] sm:$0xff] }
 0x526   : > { %v1367_v32 = vadd.f32 %v1366_v55, %v1365_v40  ;;  %v1395_v40 = vld [vmem:[%s5957_s6 + $0x28] sm:$0xff]  ;;  %v3784_v55 = vcombine.high %v1394_v56, %v1402_v13 }
 0x527   : > { %v3785_v15 = vcombine.low %v1395_v40, %v1403_v27 }
 0x528   : > { %v1369_v1 = vadd.f32 %v1368_v30, %v1367_v32  ;;  %v3786_v32 = vcombine.high %v1395_v40, %v1403_v27  ;;  %v1419_v30 = vld [vmem:[%s5957_s6 + $0xe8] sm:$0xff] }
 0x529   : > { %v3801_v24 = vcombine.low %v1411_v39, %v1419_v30 }
 0x52a   : > { %v1371_v34 = vadd.f32 %v1370_v60, %v1369_v1  ;;  %v3783_v1 = vcombine.low %v1394_v56, %v1402_v13  ;;  %v3802_v60 = vcombine.high %v1411_v39, %v1419_v30 }
 0x52c   : > { %v1373_v17 = vadd.f32 %v1372_v22, %v1371_v34  ;;  %v1426_v34 = vld [vmem:[%s5957_s6 + $0x120] sm:$0xff]  ;;  %v1435_v22 = vld [vmem:[%s5957_s6 + $0x168] sm:$0xff] }
 0x52e   : > { %v1375_v54 = vadd.f32 %v1374_v47, %v1373_v17  ;;  %v3799_v17 = vcombine.low %v1410_v0, %v1418_v53  ;;  %v3816_v47 = vcombine.high %v1426_v34, %v1434_v10 }
 0x530   : > { %v1377_v14 = vadd.f32 %v1376_v43, %v1375_v54  ;;  %v3818_v54 = vcombine.high %v1427_v11, %v1435_v22  ;;  %v1450_v43 = vld [vmem:[%s5957_s6 + $0x1e0] sm:$0xff] }
 0x532   : > { %v1379_v52 = vadd.f32 %v1378_v62, %v1377_v14  ;;  %v1443_v14 = vld [vmem:[%s5957_s6 + $0x1a8] sm:$0xff] }
 0x533   : > { %v1451_v62 = vld [vmem:[%s5957_s6 + $0x1e8] sm:$0xff] }
 0x534   : > { %v1381_v58 = vadd.f32 %v1380_v59, %v1379_v52  ;;  %v3815_v52 = vcombine.low %v1426_v34, %v1434_v10  ;;  %v3817_v59 = vcombine.low %v1427_v11, %v1435_v22  ;;  %v3833_v9 = vcombine.low %v1443_v14, %v1451_v62 }
 0x536   : > { %v1382_v23 = vrot.slane %v1381_v58, 4 }
 0x538   : > { %v1383_v57 = vadd.f32 %v1382_v23, %v1381_v58  ;;  %v3832_v58 = vcombine.high %v1442_v19, %v1450_v43  ;;  %v3834_v23 = vcombine.high %v1443_v14, %v1451_v62 }
 0x53a   : > { %v1384_v18 = vrot.slane %v1383_v57, 2 }
 0x53c   : > { %v1385_v31 = vadd.f32 %v1384_v18, %v1383_v57  ;;  %v1396_v57 = vld [vmem:[%s5957_s6 + $0x30] sm:$0xff] }
 0x53d   : > { %v1404_v18 = vld [vmem:[%s5957_s6 + $0x70] sm:$0xff] }
 0x53e   : > { %v1386_v48 = vrot.slane %v1385_v31, 1  ;;  %v3788_v3 = vcombine.high %v1396_v57, %v1404_v18  ;;  %v3787_v44 = vcombine.low %v1396_v57, %v1404_v18 }
 0x540   : > { %v1387_v25 = vadd.f32 %v1386_v48, %v1385_v31  ;;  %v1397_v31 = vld [vmem:[%s5957_s6 + $0x38] sm:$0xff] }
 0x541   : > { %v1405_v48 = vld [vmem:[%s5957_s6 + $0x78] sm:$0xff] }
 0x542   : > { %v1388_v29 = vmul.f32 0.00390625, %v1387_v25  ;;  %v3831_v25 = vcombine.low %v1442_v19, %v1450_v43  ;;  %v3790_v37 = vcombine.high %v1397_v31, %v1405_v48  ;;  %v3789_v8 = vcombine.low %v1397_v31, %v1405_v48 }
 0x544   : > { %v5328_v38 = vpack.c.bf16 %v1388_v29, %v1388_v29  ;;  %v1420_v29 = vld [vmem:[%s5957_s6 + $0xf0] sm:$0xff] }
 0x545   : > { %v3804_v41 = vcombine.high %v1412_v12, %v1420_v29 }
 0x546   : > { %3839 = vmatmul.mubr.msk.bf16.vlgmr.msra.gmra.mrb[8].mxu1 %vm658_vm2, %v5328_v38  ;;  %3840 = vmatmul.mubr.msk.bf16.vlgmr.msra.gmra.mrb[32].mxu0 %vm658_vm2, %v5328_v38 }
 0x547   : > { %1860 = vmatpush1.bf16.msra.mxu1 %v3779_v7  ;;  %1901 = vmatpush1.bf16.msra.mxu0 %v3781_v26  ;;  %v3828_v7 = vcombine.high %v1440_v2, %v1448_v51  ;;  %v3830_v26 = vcombine.high %v1441_v50, %v1449_v21  ;;  %v3803_v2 = vcombine.low %v1412_v12, %v1420_v29 }
 0x548   : > { %1861 = vmatprep.subr.bf16.mxu1 %v3796_v42  ;;  %1902 = vmatprep.subr.bf16.mxu0 %v3798_v33  ;;  %v1413_v42 = vld [vmem:[%s5957_s6 + $0xb8] sm:$0xff] }
 0x549   : > { %1891 = vmatprep.mubr.bf16.mxu1 %v4546_v28  ;;  %1932 = vmatprep.mubr.bf16.mxu0 %v4546_v28  ;;  %v1421_v33 = vld [vmem:[%s5957_s6 + $0xf8] sm:$0xff] }
 0x54a   : > { %v3806_v45 = vcombine.high %v1413_v42, %v1421_v33  ;;  %v3805_v51 = vcombine.low %v1413_v42, %v1421_v33 }
 0x54b   : > { %1862 = vmatpush1.bf16.msra.mxu1 %v3795_v35  ;;  %1903 = vmatpush1.bf16.msra.mxu0 %v3797_v49  ;;  %v1428_v35 = vld [vmem:[%s5957_s6 + $0x130] sm:$0xff] }
 0x54c   : > { %1863 = vmatprep.subr.bf16.mxu1 %v3812_v36  ;;  %1904 = vmatprep.subr.bf16.mxu0 %v3814_v46  ;;  %v1436_v49 = vld [vmem:[%s5957_s6 + $0x170] sm:$0xff]  ;;  %v1429_v36 = vld [vmem:[%s5957_s6 + $0x138] sm:$0xff] }
 0x54d   : > { %v1437_v46 = vld [vmem:[%s5957_s6 + $0x178] sm:$0xff]  ;;  %v3820_v50 = vcombine.high %v1428_v35, %v1436_v49  ;;  %v3819_v56 = vcombine.low %v1428_v35, %v1436_v49 }
 0x54e   : > { %v3822_v21 = vcombine.high %v1429_v36, %v1437_v46  ;;  %v3821_v13 = vcombine.low %v1429_v36, %v1437_v46 }
 0x54f   : > { %1864 = vmatpush1.bf16.msra.mxu1 %v3811_v61  ;;  %1905 = vmatpush1.bf16.msra.mxu0 %v3813_v16  ;;  %v1444_v61 = vld [vmem:[%s5957_s6 + $0x1b0] sm:$0xff] }
 0x550   : > { %1865 = vmatprep.subr.bf16.mxu1 %v3828_v7  ;;  %1906 = vmatprep.subr.bf16.mxu0 %v3830_v26  ;;  %v1452_v16 = vld [vmem:[%s5957_s6 + $0x1f0] sm:$0xff]  ;;  %v1445_v7 = vld [vmem:[%s5957_s6 + $0x1b8] sm:$0xff] }
 0x551   : > { %v1453_v26 = vld [vmem:[%s5957_s6 + $0x1f8] sm:$0xff]  ;;  %v3836_v40 = vcombine.high %v1444_v61, %v1452_v16 }
 0x552   : > { %v3838_v27 = vcombine.high %v1445_v7, %v1453_v26 }
 0x553   : > { %1866 = vmatpush1.bf16.msra.mxu1 %v3827_v63  ;;  %1907 = vmatpush1.bf16.msra.mxu0 %v3829_v6  ;;  %v3835_v63 = vcombine.low %v1444_v61, %v1452_v16  ;;  %v3837_v6 = vcombine.low %v1445_v7, %v1453_v26 }
 0x554   : > { %1941 = vmatprep.subr.bf16.mxu1 %v3784_v55  ;;  %1982 = vmatprep.subr.bf16.mxu0 %v3786_v32 }
 0x556   : > { %3841 = vmatmul.mubr.msk.bf16.vlgmr.msra.gmra.mrb[12].mxu1 %vm658_vm2, %v5328_v38  ;;  %3842 = vmatmul.mubr.msk.bf16.vlgmr.msra.gmra.mrb[36].mxu0 %vm658_vm2, %v5328_v38 }
 0x557   : > { %1942 = vmatpush1.bf16.msra.mxu1 %v3783_v1  ;;  %1983 = vmatpush1.bf16.msra.mxu0 %v3785_v15 }
 0x558   : > { %1943 = vmatprep.subr.bf16.mxu1 %v3800_v4  ;;  %1984 = vmatprep.subr.bf16.mxu0 %v3802_v60 }
 0x559   : > { %1973 = vmatprep.mubr.bf16.mxu1 %v4546_v28  ;;  %2014 = vmatprep.mubr.bf16.mxu0 %v4546_v28 }
 0x55b   : > { %1944 = vmatpush1.bf16.msra.mxu1 %v3799_v17  ;;  %1985 = vmatpush1.bf16.msra.mxu0 %v3801_v24 }
 0x55c   : > { %1945 = vmatprep.subr.bf16.mxu1 %v3816_v47  ;;  %1986 = vmatprep.subr.bf16.mxu0 %v3818_v54 }
 0x55f   : > { %1946 = vmatpush1.bf16.msra.mxu1 %v3815_v52  ;;  %1987 = vmatpush1.bf16.msra.mxu0 %v3817_v59 }
 0x560   : > { %1947 = vmatprep.subr.bf16.mxu1 %v3832_v58  ;;  %1988 = vmatprep.subr.bf16.mxu0 %v3834_v23 }
 0x563   : > { %1948 = vmatpush1.bf16.msra.mxu1 %v3831_v25  ;;  %1989 = vmatpush1.bf16.msra.mxu0 %v3833_v9  ;;  %v4547_v25 = vmov (!%p3847_p4), -inf  }
 0x564   : > { %2023 = vmatprep.subr.bf16.mxu1 %v3788_v3  ;;  %2064 = vmatprep.subr.bf16.mxu0 %v3790_v37  ;;  %2109 = vst [vmem:[#allocation2] sm:$0xff] (!%p3847_p4), %v4547_v25  ;;  %2110 = vst [vmem:[#allocation2 + $0x8] sm:$0xff] (!%p3847_p4), %v4547_v25 }
 0x566   : > { %3843 = vmatmul.mubr.msk.bf16.vlgmr.msra.gmra.mrb[16].mxu1 %vm658_vm2, %v5328_v38  ;;  %3844 = vmatmul.mubr.msk.bf16.vlgmr.msra.gmra.mrb[40].mxu0 %vm658_vm2, %v5328_v38 }
 0x567   : > { %2024 = vmatpush1.bf16.msra.mxu1 %v3787_v44  ;;  %2065 = vmatpush1.bf16.msra.mxu0 %v3789_v8 }
 0x568   : > { %2025 = vmatprep.subr.bf16.mxu1 %v3804_v41  ;;  %2066 = vmatprep.subr.bf16.mxu0 %v3806_v45 }
 0x569   : > { %2055 = vmatprep.mubr.bf16.mxu1 %v4546_v28  ;;  %2096 = vmatprep.mubr.bf16.mxu0 %v4546_v28 }
 0x56b   : > { %2026 = vmatpush1.bf16.msra.mxu1 %v3803_v2  ;;  %2067 = vmatpush1.bf16.msra.mxu0 %v3805_v51 }
 0x56c   : > { %2027 = vmatprep.subr.bf16.mxu1 %v3820_v50  ;;  %2068 = vmatprep.subr.bf16.mxu0 %v3822_v21 }
 0x56f   : > { %2028 = vmatpush1.bf16.msra.mxu1 %v3819_v56  ;;  %2069 = vmatpush1.bf16.msra.mxu0 %v3821_v13 }
 0x570   : > { %2029 = vmatprep.subr.bf16.mxu1 %v3836_v40  ;;  %2070 = vmatprep.subr.bf16.mxu0 %v3838_v27 }
 0x573   : > { %2030 = vmatpush1.bf16.msra.mxu1 %v3835_v63  ;;  %2071 = vmatpush1.bf16.msra.mxu0 %v3837_v6 }
 0x576   : > { %3845 = vmatmul.mubr.msk.bf16.vlgmr.msra.gmra.mrb[20].mxu1 %vm658_vm2, %v5328_v38  ;;  %3846 = vmatmul.mubr.msk.bf16.vlgmr.msra.gmra.mrb[44].mxu0 %vm658_vm2, %v5328_v38 }
 0x619   : > { %v1811_v28 = vpop.f32.mrb[8].mxu1  ;;  %v1852_v55 = vpop.f32.mrb[32].mxu0 }
 0x61a   : > { %v1813_v32 = vpop.f32.mrb[9].mxu1  ;;  %v1854_v0 = vpop.f32.mrb[33].mxu0 }
 0x61b   : > { %v1815_v53 = vpop.f32.mrb[10].mxu1  ;;  %v1856_v39 = vpop.f32.mrb[34].mxu0 }
 0x61c   : > { %v1816_v30 = vpop.f32.mrb[11].mxu1  ;;  %v1857_v1 = vpop.f32.mrb[35].mxu0 }
 0x629   : > { %v1893_v15 = vpop.f32.mrb[12].mxu1  ;;  %v1934_v4 = vpop.f32.mrb[36].mxu0 }
 0x62a   : > { %v1895_v60 = vpop.f32.mrb[13].mxu1  ;;  %v1936_v34 = vpop.f32.mrb[37].mxu0 }
 0x62b   : > { %v1897_v10 = vpop.f32.mrb[14].mxu1  ;;  %v1938_v11 = vpop.f32.mrb[38].mxu0 }
 0x62c   : > { %v1898_v22 = vpop.f32.mrb[15].mxu1  ;;  %v1939_v17 = vpop.f32.mrb[39].mxu0 }
 0x639   : > { %v1975_v24 = vpop.f32.mrb[16].mxu1  ;;  %v2016_v47 = vpop.f32.mrb[40].mxu0 }
 0x63a   : > { %v1977_v54 = vpop.f32.mrb[17].mxu1  ;;  %v2018_v38 = vpop.f32.mrb[41].mxu0 }
 0x63b   : > { %v1979_v19 = vpop.f32.mrb[18].mxu1  ;;  %v2020_v43 = vpop.f32.mrb[42].mxu0 }
 0x63c   : > { %v1980_v14 = vpop.f32.mrb[19].mxu1  ;;  %v2021_v62 = vpop.f32.mrb[43].mxu0 }
 0x646   : > { %2108 = sbr.rel (%p3847_p4) target bundleno = 1613 (0x64d), region = 60 }
 0x649   : > { %v2057_v52 = vpop.f32.mrb[20].mxu1  ;;  %v2098_v59 = vpop.f32.mrb[44].mxu0 }
 0x64a   : > { %v2059_v58 = vpop.f32.mrb[21].mxu1  ;;  %v2100_v23 = vpop.f32.mrb[45].mxu0 }
 0x64b   : > { %v2061_v57 = vpop.f32.mrb[22].mxu1  ;;  %v2102_v18 = vpop.f32.mrb[46].mxu0 }
 0x64c   : > { %v2062_v31 = vpop.f32.mrb[23].mxu1  ;;  %v2103_v48 = vpop.f32.mrb[47].mxu0 }
 0x64d PF: > { %v4548_v9 = vmov 1966171168   ;;  %v2129_v37 = vcombine.low %v1811_v28, %v1813_v32  ;;  %v2130_v12 = vcombine.low %v1852_v55, %v1854_v0  ;;  %v2131_v29 = vcombine.low %v1893_v15, %v1895_v60  ;;  %v2111_v27 = vld [vmem:[#allocation2] sm:$0xff]  ;;  %v2112_v55 = vld [vmem:[#allocation2 + $0x8] sm:$0xff]  ;;  %p3848_p5 = scmp.ne.s32.totalorder %s4606_s10, 1 }
 0x64e   : > { %v2134_v3 = vunpack.c.l.s4 %v4548_v9  ;;  %v2132_v42 = vcombine.low %v1934_v4, %v1936_v34  ;;  %v2178_v44 = vcombine.low %v1975_v24, %v1977_v54  ;;  %v2179_v8 = vcombine.low %v2016_v47, %v2018_v38  ;;  %v4377_v39 = vld [vmem:[%s5958_s7 + $0x40] sm:$0xff] (!%p3848_p5)   ;;  %v4381_v4 = vld [vmem:[%s5958_s7 + $0x48] sm:$0xff] (!%p3848_p5)   ;;  %v4385_v11 = vld [vmem:[%s5958_s7 + $0x50] sm:$0xff] (!%p3848_p5)  }
 0x64f   : > { %v2180_v41 = vcombine.low %v2057_v52, %v2059_v58  ;;  %v2181_v45 = vcombine.low %v2098_v59, %v2100_v23  ;;  %v4378_v30 = vld [vmem:[%s5958_s7 + $0xc0] sm:$0xff] (!%p3848_p5)   ;;  %4028 = vmatprep.subr.bf16.mxu0 (!%p3848_p5), %v4377_v39  ;;  %v4382_v60 = vld [vmem:[%s5958_s7 + $0xc8] sm:$0xff] (!%p3848_p5)   ;;  %v4386_v22 = vld [vmem:[%s5958_s7 + $0xd0] sm:$0xff] (!%p3848_p5)   ;;  %v2247_v25 = vsub.s32 (!%p3848_p5), 1, %v4860_v5 }
 0x650   : > { %v2135_v33 = vunpack.c.0.s8 %v2134_v3  ;;  %v4379_v1 = vld [vmem:[%s5958_s7] sm:$0xff] (!%p3848_p5)   ;;  %4050 = vmatprep.subr.bf16.mxu1 (!%p3848_p5), %v4378_v30  ;;  %v4383_v34 = vld [vmem:[%s5958_s7 + $0x8] sm:$0xff] (!%p3848_p5)   ;;  %v4387_v17 = vld [vmem:[%s5958_s7 + $0x10] sm:$0xff] (!%p3848_p5)   ;;  %v2255_v3 = vsub.s32 (!%p3848_p5), 3, %v4860_v5 }
 0x651   : > { %v4380_v15 = vld [vmem:[%s5958_s7 + $0x80] sm:$0xff] (!%p3848_p5)   ;;  %4029 = vmatpush3.bf16.msra.mxu0 (!%p3848_p5), %v4379_v1  ;;  %v4384_v10 = vld [vmem:[%s5958_s7 + $0x88] sm:$0xff] (!%p3848_p5)   ;;  %v4388_v24 = vld [vmem:[%s5958_s7 + $0x90] sm:$0xff] (!%p3848_p5)  }
 0x652   : > { %v2138_v35 = vsub.s32 %v2135_v33, %v4860_v5  ;;  %4051 = vmatpush3.bf16.msra.mxu1 (!%p3848_p5), %v4380_v15  ;;  %4030 = vmatprep.subr.bf16.mxu0 (!%p3848_p5), %v4381_v4  ;;  %v4389_v47 = vld [vmem:[%s5958_s7 + $0x58] sm:$0xff] (!%p3848_p5)   ;;  %v4393_v43 = vld [vmem:[%s5958_s7 + $0x60] sm:$0xff] (!%p3848_p5)   ;;  %v4397_v59 = vld [vmem:[%s5958_s7 + $0x68] sm:$0xff] (!%p3848_p5)  }
 0x653   : > { %4052 = vmatprep.subr.bf16.mxu1 (!%p3848_p5), %v4382_v60  ;;  %v4390_v54 = vld [vmem:[%s5958_s7 + $0xd8] sm:$0xff] (!%p3848_p5)   ;;  %v4394_v14 = vld [vmem:[%s5958_s7 + $0xe0] sm:$0xff] (!%p3848_p5)   ;;  %v4398_v58 = vld [vmem:[%s5958_s7 + $0xe8] sm:$0xff] (!%p3848_p5)  }
 0x654   : > { %v2139_v49 = vrot.slane %v2129_v37, %v2138_v35  ;;  %v2146_v36 = vrot.slane %v2130_v12, %v2138_v35  ;;  %v2153_v46 = vrot.slane %v2131_v29, %v2138_v35  ;;  %v2160_v2 = vrot.slane %v2132_v42, %v2138_v35  ;;  %v4391_v38 = vld [vmem:[%s5958_s7 + $0x18] sm:$0xff] (!%p3848_p5)   ;;  %v4395_v62 = vld [vmem:[%s5958_s7 + $0x20] sm:$0xff] (!%p3848_p5)   ;;  %v4399_v23 = vld [vmem:[%s5958_s7 + $0x28] sm:$0xff] (!%p3848_p5)  }
 0x655   : > { %v2188_v51 = vrot.slane %v2178_v44, %v2138_v35  ;;  %v2195_v50 = vrot.slane %v2179_v8, %v2138_v35  ;;  %v2202_v21 = vrot.slane %v2180_v41, %v2138_v35  ;;  %v2209_v61 = vrot.slane %v2181_v45, %v2138_v35  ;;  %4031 = vmatpush3.bf16.msra.mxu0 (!%p3848_p5), %v4383_v34  ;;  %v4392_v19 = vld [vmem:[%s5958_s7 + $0x98] sm:$0xff] (!%p3848_p5)   ;;  %v4396_v52 = vld [vmem:[%s5958_s7 + $0xa0] sm:$0xff] (!%p3848_p5)   ;;  %v4400_v57 = vld [vmem:[%s5958_s7 + $0xa8] sm:$0xff] (!%p3848_p5)  }
 0x656   : > { %v2161_v16 = vcombine.low %v2139_v49, %v2146_v36  ;;  %v2162_v7 = vcombine.low %v2153_v46, %v2160_v2  ;;  %4053 = vmatpush3.bf16.msra.mxu1 (!%p3848_p5), %v4384_v10  ;;  %4032 = vmatprep.subr.bf16.mxu0 (!%p3848_p5), %v4385_v11  ;;  %v4401_v18 = vld [vmem:[%s5958_s7 + $0x70] sm:$0xff] (!%p3848_p5)   ;;  %v4405_v37 = vld [vmem:[%s5958_s7 + $0x78] sm:$0xff] (!%p3848_p5)   ;;  %v2251_v12 = vsub.s32 (!%p3848_p5), 2, %v4860_v5  ;;  %v2263_v42 = vsub.s32 (!%p3848_p5), 5, %v4860_v5  ;;  %v4409_v46 = vld [vmem:[%s5958_s7 + $0x140] sm:$0xff] (!%p3848_p5)  }
 0x657   : > { %v2210_v26 = vcombine.low %v2188_v51, %v2195_v50  ;;  %v2211_v56 = vcombine.low %v2202_v21, %v2209_v61  ;;  %4054 = vmatprep.subr.bf16.mxu1 (!%p3848_p5), %v4386_v22  ;;  %v4402_v31 = vld [vmem:[%s5958_s7 + $0xf0] sm:$0xff] (!%p3848_p5)   ;;  %v4406_v29 = vld [vmem:[%s5958_s7 + $0xf8] sm:$0xff] (!%p3848_p5)   ;;  %v2271_v44 = vsub.s32 (!%p3848_p5), 7, %v4860_v5  ;;  %v4410_v2 = vld [vmem:[%s5958_s7 + $0x1c0] sm:$0xff] (!%p3848_p5)  }
 0x658   : > { %v2169_v13 = vrot.slane %v2161_v16, %v2138_v35  ;;  %v2176_v40 = vrot.slane %v2162_v7, %v2138_v35  ;;  %v4403_v48 = vld [vmem:[%s5958_s7 + $0x30] sm:$0xff] (!%p3848_p5)   ;;  %v4407_v33 = vld [vmem:[%s5958_s7 + $0x38] sm:$0xff] (!%p3848_p5)   ;;  %v4425_v4 = vld [vmem:[%s5958_s7 + $0x160] sm:$0xff] (!%p3848_p5)  }
 0x659   : > { %v2218_v63 = vrot.slane %v2210_v26, %v2138_v35  ;;  %v2225_v6 = vrot.slane %v2211_v56, %v2138_v35  ;;  %2236 = sbr.rel (%p3848_p5) target bundleno = 1964 (0x7ac), region = 64  ;;  %4033 = vmatpush3.bf16.msra.mxu0 (!%p3848_p5), %v4387_v17  ;;  %v4404_v9 = vld [vmem:[%s5958_s7 + $0xb0] sm:$0xff] (!%p3848_p5)   ;;  %v4408_v8 = vld [vmem:[%s5958_s7 + $0xb8] sm:$0xff] (!%p3848_p5)   ;;  %v4411_v26 = vld [vmem:[%s5958_s7 + $0x100] sm:$0xff] (!%p3848_p5)  }
 0x65a   : > { %v2177_v28 = vcombine.low %v2169_v13, %v2176_v40  ;;  %4055 = vmatpush3.bf16.msra.mxu1 (!%p3848_p5), %v4388_v24  ;;  %4034 = vmatprep.subr.bf16.mxu0 (!%p3848_p5), %v4389_v47  ;;  %v4412_v56 = vld [vmem:[%s5958_s7 + $0x180] sm:$0xff] (!%p3848_p5)   ;;  %v4413_v13 = vld [vmem:[%s5958_s7 + $0x148] sm:$0xff] (!%p3848_p5)   ;;  %v4421_v39 = vld [vmem:[%s5958_s7 + $0x158] sm:$0xff] (!%p3848_p5)  }
 0x65b   : > { %v2226_v32 = vcombine.low %v2218_v63, %v2225_v6  ;;  %4056 = vmatprep.subr.bf16.mxu1 (!%p3848_p5), %v4390_v54  ;;  %v4414_v63 = vld [vmem:[%s5958_s7 + $0x1c8] sm:$0xff] (!%p3848_p5)   ;;  %v4422_v30 = vld [vmem:[%s5958_s7 + $0x1d8] sm:$0xff] (!%p3848_p5)   ;;  %v4426_v60 = vld [vmem:[%s5958_s7 + $0x1e0] sm:$0xff] (!%p3848_p5)   ;;  %v2259_v54 = vsub.s32 (!%p3848_p5), 4, %v4860_v5 }
 0x65c   : > { %v2229_v0 = vmax.f32 %v2111_v27, %v2177_v28  ;;  %v4415_v6 = vld [vmem:[%s5958_s7 + $0x108] sm:$0xff] (!%p3848_p5)   ;;  %v4423_v1 = vld [vmem:[%s5958_s7 + $0x118] sm:$0xff] (!%p3848_p5)   ;;  %v4427_v34 = vld [vmem:[%s5958_s7 + $0x120] sm:$0xff] (!%p3848_p5)  }
 0x65d   : > { %v2230_v53 = vmax.f32 %v2112_v55, %v2226_v32  ;;  %4035 = vmatpush3.bf16.msra.mxu0 (!%p3848_p5), %v4391_v38  ;;  %v4416_v28 = vld [vmem:[%s5958_s7 + $0x188] sm:$0xff] (!%p3848_p5)   ;;  %v4417_v55 = vld [vmem:[%s5958_s7 + $0x150] sm:$0xff] (!%p3848_p5)   ;;  %v4424_v15 = vld [vmem:[%s5958_s7 + $0x198] sm:$0xff] (!%p3848_p5)  }
 0x65e   : > { %2231 = vst [vmem:[#allocation2] sm:$0xff] %v2229_v0  ;;  %4057 = vmatpush3.bf16.msra.mxu1 (!%p3848_p5), %v4392_v19  ;;  %4036 = vmatprep.subr.bf16.mxu0 (!%p3848_p5), %v4393_v43  ;;  %v4418_v32 = vld [vmem:[%s5958_s7 + $0x1d0] sm:$0xff] (!%p3848_p5)   ;;  %v4428_v10 = vld [vmem:[%s5958_s7 + $0x1a0] sm:$0xff] (!%p3848_p5)   ;;  %v4429_v11 = vld [vmem:[%s5958_s7 + $0x168] sm:$0xff] (!%p3848_p5)   ;;  %v2267_v19 = vsub.s32 (!%p3848_p5), 6, %v4860_v5 }
 0x65f   : > { %2232 = vst [vmem:[#allocation2 + $0x8] sm:$0xff] %v2230_v53  ;;  %4058 = vmatprep.subr.bf16.mxu1 (!%p3848_p5), %v4394_v14  ;;  %v4419_v0 = vld [vmem:[%s5958_s7 + $0x110] sm:$0xff] (!%p3848_p5)   ;;  %v4430_v22 = vld [vmem:[%s5958_s7 + $0x1e8] sm:$0xff] (!%p3848_p5)  }
 0x660   : > { %v4420_v53 = vld [vmem:[%s5958_s7 + $0x190] sm:$0xff]   ;;  %v4431_v17 = vld [vmem:[%s5958_s7 + $0x128] sm:$0xff]  }
 0x661   : > { %4037 = vmatpush3.bf16.msra.mxu0 %v4395_v62  ;;  %v4432_v24 = vld [vmem:[%s5958_s7 + $0x1a8] sm:$0xff]   ;;  %v4433_v47 = vld [vmem:[%s5958_s7 + $0x170] sm:$0xff]   ;;  %v4437_v62 = vld [vmem:[%s5958_s7 + $0x178] sm:$0xff]  }
 0x662   : > { %4059 = vmatpush3.bf16.msra.mxu1 %v4396_v52  ;;  %4038 = vmatprep.subr.bf16.mxu0 %v4397_v59  ;;  %v4434_v38 = vld [vmem:[%s5958_s7 + $0x1f0] sm:$0xff]   ;;  %v4438_v52 = vld [vmem:[%s5958_s7 + $0x1f8] sm:$0xff]  }
 0x663   : > { %4060 = vmatprep.subr.bf16.mxu1 %v4398_v58  ;;  %v4435_v43 = vld [vmem:[%s5958_s7 + $0x130] sm:$0xff]  }
 0x664   : > { %v4436_v14 = vld [vmem:[%s5958_s7 + $0x1b0] sm:$0xff]  }
 0x665   : > { %4039 = vmatpush3.bf16.msra.mxu0 %v4399_v23  ;;  %v5582_v41 = vld [vmem:[#allocation2] sm:$0xff]  ;;  %v4439_v23 = vld [vmem:[%s5958_s7 + $0x138] sm:$0xff]  }
 0x666   : > { %4061 = vmatpush3.bf16.msra.mxu1 %v4400_v57  ;;  %4040 = vmatprep.subr.bf16.mxu0 %v4401_v18  ;;  %v2248_v45 = vrot.slane %v5582_v41, %v2247_v25  ;;  %v2256_v35 = vrot.slane %v5582_v41, %v2255_v3  ;;  %v2244_v49 = vrot.slane %v5582_v41, %v4863_v20  ;;  %v4440_v57 = vld [vmem:[%s5958_s7 + $0x1b8] sm:$0xff]   ;;  %v4441_v18 = vld [vmem:[%s5958_s7 + $0x240] sm:$0xff]  }
 0x667   : > { %4062 = vmatprep.subr.bf16.mxu1 %v4402_v31  ;;  %v2252_v36 = vrot.slane %v5582_v41, %v2251_v12  ;;  %v2264_v51 = vrot.slane %v5582_v41, %v2263_v42  ;;  %v2272_v50 = vrot.slane %v5582_v41, %v2271_v44  ;;  %v2260_v59 = vrot.slane %v5582_v41, %v2259_v54 }
 0x668   : > { %v2322_v21 = vpack.c.bf16 %v2248_v45, %v2248_v45  ;;  %v2324_v61 = vpack.c.bf16 %v2256_v35, %v2256_v35  ;;  %v2321_v16 = vpack.c.bf16 %v2244_v49, %v2244_v49  ;;  %v2268_v58 = vrot.slane %v5582_v41, %v2267_v19  ;;  %v4447_v41 = vld [vmem:[%s5958_s7 + $0x208] sm:$0xff]   ;;  %v4449_v35 = vld [vmem:[%s5958_s7 + $0x250] sm:$0xff]  }
 0x669   : > { %4041 = vmatpush3.bf16.msra.mxu0 %v4403_v48  ;;  %v2323_v7 = vpack.c.bf16 %v2252_v36, %v2252_v36  ;;  %v2326_v40 = vpack.c.bf16 %v2264_v51, %v2264_v51  ;;  %v2328_v27 = vpack.c.bf16 %v2272_v50, %v2272_v50  ;;  %v2325_v31 = vpack.c.bf16 %v2260_v59, %v2260_v59  ;;  %v4448_v45 = vld [vmem:[%s5958_s7 + $0x288] sm:$0xff]   ;;  %v4450_v49 = vld [vmem:[%s5958_s7 + $0x2d0] sm:$0xff]   ;;  %v4454_v51 = vld [vmem:[%s5958_s7 + $0x2d8] sm:$0xff]  }
 0x66a   : > { %4063 = vmatpush3.bf16.msra.mxu1 %v4404_v9  ;;  %4042 = vmatprep.subr.bf16.mxu0 %v4405_v37  ;;  %v2327_v48 = vpack.c.bf16 %v2268_v58, %v2268_v58  ;;  %v4442_v9 = vld [vmem:[%s5958_s7 + $0x2c0] sm:$0xff]   ;;  %v4451_v36 = vld [vmem:[%s5958_s7 + $0x210] sm:$0xff]   ;;  %v4455_v50 = vld [vmem:[%s5958_s7 + $0x218] sm:$0xff]  }
 0x66b   : > { %4064 = vmatprep.subr.bf16.mxu1 %v4406_v29  ;;  %3394 = vmatprep.mubr.bf16.mxu0 %v2322_v21  ;;  %v4443_v37 = vld [vmem:[%s5958_s7 + $0x200] sm:$0xff]   ;;  %v4456_v21 = vld [vmem:[%s5958_s7 + $0x298] sm:$0xff]   ;;  %v4483_v59 = vld [vmem:[%s5958_s7 + $0x310] sm:$0xff]  }
 0x66c   : > { %3434 = vmatprep.mubr.bf16.mxu1 %v2324_v61  ;;  %v4444_v29 = vld [vmem:[%s5958_s7 + $0x280] sm:$0xff]   ;;  %v4484_v58 = vld [vmem:[%s5958_s7 + $0x390] sm:$0xff]  }
 0x66d   : > { %4043 = vmatpush3.bf16.msra.mxu0 %v4407_v33  ;;  %v4445_v33 = vld [vmem:[%s5958_s7 + $0x248] sm:$0xff]   ;;  %v4457_v61 = vld [vmem:[%s5958_s7 + $0x260] sm:$0xff]  }
 0x66e   : > { %4065 = vmatpush3.bf16.msra.mxu1 %v4408_v8  ;;  %4072 = vmatprep.subr.bf16.mxu0 %v4409_v46  ;;  %v4446_v8 = vld [vmem:[%s5958_s7 + $0x2c8] sm:$0xff]   ;;  %v4452_v46 = vld [vmem:[%s5958_s7 + $0x290] sm:$0xff]  }
 0x66f   : > { %4094 = vmatprep.subr.bf16.mxu1 %v4410_v2  ;;  %v4453_v2 = vld [vmem:[%s5958_s7 + $0x258] sm:$0xff]  }
 0x670   : > { %3395 = vmatmul.mubr.bf16.vlgmr.msra.gmra.mrb[0].mxu0 %v2321_v16  ;;  %v4458_v16 = vld [vmem:[%s5958_s7 + $0x2e0] sm:$0xff]  }
 0x671   : > { %3435 = vmatmul.mubr.bf16.vlgmr.msra.gmra.mrb[0].mxu1 %v2323_v7  ;;  %4073 = vmatpush3.bf16.msra.mxu0 %v4411_v26  ;;  %v4459_v7 = vld [vmem:[%s5958_s7 + $0x220] sm:$0xff]  }
 0x672   : > { %4095 = vmatpush3.bf16.msra.mxu1 %v4412_v56  ;;  %4074 = vmatprep.subr.bf16.mxu0 %v4413_v13  ;;  %v4460_v26 = vld [vmem:[%s5958_s7 + $0x2a0] sm:$0xff]   ;;  %v4461_v56 = vld [vmem:[%s5958_s7 + $0x268] sm:$0xff]  }
 0x673   : > { %4096 = vmatprep.subr.bf16.mxu1 %v4414_v63  ;;  %3474 = vmatprep.mubr.bf16.mxu0 %v2326_v40  ;;  %v4462_v13 = vld [vmem:[%s5958_s7 + $0x2e8] sm:$0xff]   ;;  %v4465_v63 = vld [vmem:[%s5958_s7 + $0x270] sm:$0xff]  }
 0x674   : > { %3514 = vmatprep.mubr.bf16.mxu1 %v2328_v27  ;;  %v4463_v40 = vld [vmem:[%s5958_s7 + $0x228] sm:$0xff]  }
 0x675   : > { %4075 = vmatpush3.bf16.msra.mxu0 %v4415_v6  ;;  %v4464_v27 = vld [vmem:[%s5958_s7 + $0x2a8] sm:$0xff]   ;;  %v4466_v6 = vld [vmem:[%s5958_s7 + $0x2f0] sm:$0xff]  }
 0x676   : > { %4097 = vmatpush3.bf16.msra.mxu1 %v4416_v28  ;;  %4076 = vmatprep.subr.bf16.mxu0 %v4417_v55  ;;  %v4467_v28 = vld [vmem:[%s5958_s7 + $0x230] sm:$0xff]  }
 0x677   : > { %4098 = vmatprep.subr.bf16.mxu1 %v4418_v32  ;;  %v4468_v55 = vld [vmem:[%s5958_s7 + $0x2b0] sm:$0xff]   ;;  %v4469_v32 = vld [vmem:[%s5958_s7 + $0x278] sm:$0xff]  }
 0x679   : > { %4077 = vmatpush3.bf16.msra.mxu0 %v4419_v0  ;;  %v4470_v0 = vld [vmem:[%s5958_s7 + $0x2f8] sm:$0xff]  }
 0x67a   : > { %4099 = vmatpush3.bf16.msra.mxu1 %v4420_v53  ;;  %4078 = vmatprep.subr.bf16.mxu0 %v4421_v39  ;;  %v4471_v53 = vld [vmem:[%s5958_s7 + $0x238] sm:$0xff]  }
 0x67b   : > { %4100 = vmatprep.subr.bf16.mxu1 %v4422_v30  ;;  %v4472_v39 = vld [vmem:[%s5958_s7 + $0x2b8] sm:$0xff]   ;;  %v5801_v30 = vld [vmem:[#allocation2 + $0x8] sm:$0xff] }
 0x67d   : > { %4079 = vmatpush3.bf16.msra.mxu0 %v4423_v1  ;;  %v2280_v1 = vrot.slane %v5801_v30, %v2247_v25  ;;  %v2296_v25 = vrot.slane %v5801_v30, %v2263_v42  ;;  %v4476_v42 = vld [vmem:[%s5958_s7 + $0x380] sm:$0xff]  }
 0x67e   : > { %4101 = vmatpush3.bf16.msra.mxu1 %v4424_v15  ;;  %4080 = vmatprep.subr.bf16.mxu0 %v4425_v4  ;;  %v2288_v15 = vrot.slane %v5801_v30, %v2255_v3  ;;  %v2276_v4 = vrot.slane %v5801_v30, %v4863_v20  ;;  %v2304_v20 = vrot.slane %v5801_v30, %v2271_v44  ;;  %v4477_v44 = vld [vmem:[%s5958_s7 + $0x348] sm:$0xff]  }
 0x67f   : > { %4102 = vmatprep.subr.bf16.mxu1 %v4426_v60  ;;  %v2284_v60 = vrot.slane %v5801_v30, %v2251_v12  ;;  %v2330_v3 = vpack.c.bf16 %v2280_v1, %v2280_v1 }
 0x680   : > { %v2332_v12 = vpack.c.bf16 %v2288_v15, %v2288_v15 }
 0x681   : > { %4081 = vmatpush3.bf16.msra.mxu0 %v4427_v34  ;;  %v4473_v34 = vld [vmem:[%s5958_s7 + $0x340] sm:$0xff]  }
 0x682   : > { %4103 = vmatpush3.bf16.msra.mxu1 %v4428_v10  ;;  %4082 = vmatprep.subr.bf16.mxu0 %v4429_v11  ;;  %v4474_v10 = vld [vmem:[%s5958_s7 + $0x3c0] sm:$0xff]   ;;  %v2329_v11 = vpack.c.bf16 %v2276_v4, %v2276_v4 }
 0x683   : > { %4104 = vmatprep.subr.bf16.mxu1 %v4430_v22  ;;  %v4475_v22 = vld [vmem:[%s5958_s7 + $0x300] sm:$0xff]  }
 0x685   : > { %4083 = vmatpush3.bf16.msra.mxu0 %v4431_v17  ;;  %v2331_v17 = vpack.c.bf16 %v2284_v60, %v2284_v60 }
 0x686   : > { %4105 = vmatpush3.bf16.msra.mxu1 %v4432_v24  ;;  %4084 = vmatprep.subr.bf16.mxu0 %v4433_v47  ;;  %v2334_v24 = vpack.c.bf16 %v2296_v25, %v2296_v25  ;;  %v2336_v47 = vpack.c.bf16 %v2304_v20, %v2304_v20 }
 0x687   : > { %4106 = vmatprep.subr.bf16.mxu1 %v4434_v38  ;;  %v4478_v38 = vld [vmem:[%s5958_s7 + $0x3c8] sm:$0xff]  }
 0x689   : > { %4085 = vmatpush3.bf16.msra.mxu0 %v4435_v43  ;;  %v4479_v43 = vld [vmem:[%s5958_s7 + $0x308] sm:$0xff]  }
 0x68a   : > { %4107 = vmatpush3.bf16.msra.mxu1 %v4436_v14  ;;  %4086 = vmatprep.subr.bf16.mxu0 %v4437_v62  ;;  %v4480_v14 = vld [vmem:[%s5958_s7 + $0x388] sm:$0xff]   ;;  %v4481_v62 = vld [vmem:[%s5958_s7 + $0x350] sm:$0xff]  }
 0x68b   : > { %4108 = vmatprep.subr.bf16.mxu1 %v4438_v52  ;;  %v4482_v52 = vld [vmem:[%s5958_s7 + $0x3d0] sm:$0xff]  }
 0x68d   : > { %4087 = vmatpush3.bf16.msra.mxu0 %v4439_v23  ;;  %v4485_v23 = vld [vmem:[%s5958_s7 + $0x358] sm:$0xff]  }
 0x68e   : > { %4109 = vmatpush3.bf16.msra.mxu1 %v4440_v57  ;;  %4116 = vmatprep.subr.bf16.mxu0 %v4441_v18  ;;  %v4486_v57 = vld [vmem:[%s5958_s7 + $0x3d8] sm:$0xff]  }
 0x68f   : > { %4138 = vmatprep.subr.bf16.mxu1 %v4442_v9  ;;  %v4487_v18 = vld [vmem:[%s5958_s7 + $0x318] sm:$0xff]   ;;  %v4490_v9 = vld [vmem:[%s5958_s7 + $0x3e0] sm:$0xff]  }
 0x690   : > { %3475 = vmatmul.mubr.bf16.vlgmr.msra.gmra.mrb[4].mxu0 %v2325_v31  ;;  %v4488_v31 = vld [vmem:[%s5958_s7 + $0x398] sm:$0xff]  }
 0x691   : > { %3515 = vmatmul.mubr.bf16.vlgmr.msra.gmra.mrb[4].mxu1 %v2327_v48  ;;  %4117 = vmatpush3.bf16.msra.mxu0 %v4443_v37  ;;  %v4489_v48 = vld [vmem:[%s5958_s7 + $0x360] sm:$0xff]  }
 0x692   : > { %4139 = vmatpush3.bf16.msra.mxu1 %v4444_v29  ;;  %4118 = vmatprep.subr.bf16.mxu0 %v4445_v33  ;;  %v4491_v37 = vld [vmem:[%s5958_s7 + $0x320] sm:$0xff]   ;;  %v4493_v33 = vld [vmem:[%s5958_s7 + $0x368] sm:$0xff]  }
 0x693   : > { %4140 = vmatprep.subr.bf16.mxu1 %v4446_v8  ;;  %3554 = vmatprep.mubr.bf16.mxu0 %v2330_v3  ;;  %v4492_v29 = vld [vmem:[%s5958_s7 + $0x3a0] sm:$0xff]   ;;  %v4494_v8 = vld [vmem:[%s5958_s7 + $0x3e8] sm:$0xff]  }
 0x694   : > { %3594 = vmatprep.mubr.bf16.mxu1 %v2332_v12 }
 0x695   : > { %4119 = vmatpush3.bf16.msra.mxu0 %v4447_v41  ;;  %v4495_v41 = vld [vmem:[%s5958_s7 + $0x328] sm:$0xff]  }
 0x696   : > { %4141 = vmatpush3.bf16.msra.mxu1 %v4448_v45  ;;  %4120 = vmatprep.subr.bf16.mxu0 %v4449_v35  ;;  %v4496_v45 = vld [vmem:[%s5958_s7 + $0x3a8] sm:$0xff]   ;;  %v4497_v35 = vld [vmem:[%s5958_s7 + $0x370] sm:$0xff]  }
 0x697   : > { %4142 = vmatprep.subr.bf16.mxu1 %v4450_v49  ;;  %v4498_v49 = vld [vmem:[%s5958_s7 + $0x3f0] sm:$0xff]  }
 0x699   : > { %4121 = vmatpush3.bf16.msra.mxu0 %v4451_v36  ;;  %v4499_v36 = vld [vmem:[%s5958_s7 + $0x330] sm:$0xff]  }
 0x69a   : > { %4143 = vmatpush3.bf16.msra.mxu1 %v4452_v46  ;;  %4122 = vmatprep.subr.bf16.mxu0 %v4453_v2  ;;  %v4500_v46 = vld [vmem:[%s5958_s7 + $0x3b0] sm:$0xff]   ;;  %v4501_v2 = vld [vmem:[%s5958_s7 + $0x378] sm:$0xff]  }
 0x69b   : > { %4144 = vmatprep.subr.bf16.mxu1 %v4454_v51  ;;  %v4502_v51 = vld [vmem:[%s5958_s7 + $0x3f8] sm:$0xff]  }
 0x69d   : > { %4123 = vmatpush3.bf16.msra.mxu0 %v4455_v50  ;;  %v2292_v50 = vrot.slane %v5801_v30, %v2259_v54 }
 0x69e   : > { %4145 = vmatpush3.bf16.msra.mxu1 %v4456_v21  ;;  %4124 = vmatprep.subr.bf16.mxu0 %v4457_v61  ;;  %v2300_v21 = vrot.slane %v5801_v30, %v2267_v19  ;;  %v4503_v61 = vld [vmem:[%s5958_s7 + $0x338] sm:$0xff]   ;;  %v2593_v19 = vld [vmem:[%s5959_s8] sm:$0x1] }
 0x69f   : > { %4146 = vmatprep.subr.bf16.mxu1 %v4458_v16  ;;  %v4504_v16 = vld [vmem:[%s5958_s7 + $0x3b8] sm:$0xff]  }
 0x6a1   : > { %4125 = vmatpush3.bf16.msra.mxu0 %v4459_v7  ;;  %v2333_v7 = vpack.c.bf16 %v2292_v50, %v2292_v50 }
 0x6a2   : > { %4147 = vmatpush3.bf16.msra.mxu1 %v4460_v26  ;;  %4126 = vmatprep.subr.bf16.mxu0 %v4461_v56  ;;  %v2335_v26 = vpack.c.bf16 %v2300_v21, %v2300_v21 }
 0x6a3   : > { %4148 = vmatprep.subr.bf16.mxu1 %v4462_v13 }
 0x6a5   : > { %4127 = vmatpush3.bf16.msra.mxu0 %v4463_v40 }
 0x6a6   : > { %4149 = vmatpush3.bf16.msra.mxu1 %v4464_v27  ;;  %4128 = vmatprep.subr.bf16.mxu0 %v4465_v63 }
 0x6a7   : > { %4150 = vmatprep.subr.bf16.mxu1 %v4466_v6 }
 0x6a9   : > { %4129 = vmatpush3.bf16.msra.mxu0 %v4467_v28 }
 0x6aa   : > { %4151 = vmatpush3.bf16.msra.mxu1 %v4468_v55  ;;  %4130 = vmatprep.subr.bf16.mxu0 %v4469_v32 }
 0x6ab   : > { %4152 = vmatprep.subr.bf16.mxu1 %v4470_v0 }
 0x6ad   : > { %4131 = vmatpush3.bf16.msra.mxu0 %v4471_v53 }
 0x6ae   : > { %4153 = vmatpush3.bf16.msra.mxu1 %v4472_v39  ;;  %4160 = vmatprep.subr.bf16.mxu0 %v4473_v34 }
 0x6af   : > { %4182 = vmatprep.subr.bf16.mxu1 %v4474_v10 }
 0x6b0   : > { %3555 = vmatmul.mubr.bf16.vlgmr.msra.gmra.mrb[8].mxu0 %v2329_v11 }
 0x6b1   : > { %3595 = vmatmul.mubr.bf16.vlgmr.msra.gmra.mrb[8].mxu1 %v2331_v17  ;;  %4161 = vmatpush3.bf16.msra.mxu0 %v4475_v22 }
 0x6b2   : > { %4183 = vmatpush3.bf16.msra.mxu1 %v4476_v42  ;;  %4162 = vmatprep.subr.bf16.mxu0 %v4477_v44 }
 0x6b3   : > { %4184 = vmatprep.subr.bf16.mxu1 %v4478_v38  ;;  %3634 = vmatprep.mubr.bf16.mxu0 %v2334_v24 }
 0x6b4   : > { %3674 = vmatprep.mubr.bf16.mxu1 %v2336_v47 }
 0x6b5   : > { %4163 = vmatpush3.bf16.msra.mxu0 %v4479_v43 }
 0x6b6   : > { %4185 = vmatpush3.bf16.msra.mxu1 %v4480_v14  ;;  %4164 = vmatprep.subr.bf16.mxu0 %v4481_v62 }
 0x6b7   : > { %4186 = vmatprep.subr.bf16.mxu1 %v4482_v52 }
 0x6b9   : > { %4165 = vmatpush3.bf16.msra.mxu0 %v4483_v59 }
 0x6ba   : > { %4187 = vmatpush3.bf16.msra.mxu1 %v4484_v58  ;;  %4166 = vmatprep.subr.bf16.mxu0 %v4485_v23 }
 0x6bb   : > { %4188 = vmatprep.subr.bf16.mxu1 %v4486_v57 }
 0x6bd   : > { %4167 = vmatpush3.bf16.msra.mxu0 %v4487_v18 }
 0x6be   : > { %4189 = vmatpush3.bf16.msra.mxu1 %v4488_v31  ;;  %4168 = vmatprep.subr.bf16.mxu0 %v4489_v48 }
 0x6bf   : > { %4190 = vmatprep.subr.bf16.mxu1 %v4490_v9 }
 0x6c1   : > { %4169 = vmatpush3.bf16.msra.mxu0 %v4491_v37 }
 0x6c2   : > { %4191 = vmatpush3.bf16.msra.mxu1 %v4492_v29  ;;  %4170 = vmatprep.subr.bf16.mxu0 %v4493_v33 }
 0x6c3   : > { %4192 = vmatprep.subr.bf16.mxu1 %v4494_v8 }
 0x6c5   : > { %4171 = vmatpush3.bf16.msra.mxu0 %v4495_v41 }
 0x6c6   : > { %4193 = vmatpush3.bf16.msra.mxu1 %v4496_v45  ;;  %4172 = vmatprep.subr.bf16.mxu0 %v4497_v35 }
 0x6c7   : > { %4194 = vmatprep.subr.bf16.mxu1 %v4498_v49 }
 0x6c9   : > { %4173 = vmatpush3.bf16.msra.mxu0 %v4499_v36 }
 0x6ca   : > { %4195 = vmatpush3.bf16.msra.mxu1 %v4500_v46  ;;  %4174 = vmatprep.subr.bf16.mxu0 %v4501_v2 }
 0x6cb   : > { %4196 = vmatprep.subr.bf16.mxu1 %v4502_v51 }
 0x6cd   : > { %4175 = vmatpush3.bf16.msra.mxu0 %v4503_v61 }
 0x6ce   : > { %4197 = vmatpush3.bf16.msra.mxu1 %v4504_v16 }
 0x6d0   : > { %3635 = vmatmul.mubr.bf16.vlgmr.msra.gmra.mrb[12].mxu0 %v2333_v7 }
 0x6d1   : > { %3675 = vmatmul.mubr.bf16.vlgmr.msra.gmra.mrb[12].mxu1 %v2335_v26 }
 0x743   : > { %v4044_v5 = vpop.f32.mrb[0].mxu0 }
 0x744   : > { %v4066_v54 = vpop.f32.mrb[0].mxu1  ;;  %v4045_v56 = vpop.f32.mrb[1].mxu0 }
 0x745   : > { %v4067_v13 = vpop.f32.mrb[1].mxu1  ;;  %v4046_v40 = vadd.f32 %v4045_v56, %v4044_v5  ;;  %v4047_v63 = vpop.f32.mrb[2].mxu0 }
 0x746   : > { %v4068_v27 = vadd.f32 %v4067_v13, %v4066_v54  ;;  %v4069_v6 = vpop.f32.mrb[2].mxu1  ;;  %v4048_v28 = vpop.f32.mrb[3].mxu0 }
 0x747   : > { %v4070_v55 = vpop.f32.mrb[3].mxu1  ;;  %v3397_v32 = vadd.f32 %v4046_v40, %v2593_v19 }
 0x749   : > { %v3437_v0 = vadd.f32 %v4068_v27, %v3397_v32 }
 0x763   : > { %v4088_v53 = vpop.f32.mrb[4].mxu0 }
 0x764   : > { %v4110_v39 = vpop.f32.mrb[4].mxu1  ;;  %v4089_v30 = vpop.f32.mrb[5].mxu0 }
 0x765   : > { %v4111_v1 = vpop.f32.mrb[5].mxu1  ;;  %v4090_v15 = vadd.f32 %v4089_v30, %v4088_v53  ;;  %v4091_v60 = vpop.f32.mrb[6].mxu0 }
 0x766   : > { %v4112_v4 = vadd.f32 %v4111_v1, %v4110_v39  ;;  %v4113_v34 = vpop.f32.mrb[6].mxu1  ;;  %v4092_v10 = vpop.f32.mrb[7].mxu0 }
 0x767   : > { %v4114_v25 = vpop.f32.mrb[7].mxu1  ;;  %v3477_v20 = vadd.f32 %v4090_v15, %v3437_v0 }
 0x769   : > { %v3517_v3 = vadd.f32 %v4112_v4, %v3477_v20 }
 0x783   : > { %v4132_v12 = vpop.f32.mrb[8].mxu0 }
 0x784   : > { %v4154_v11 = vpop.f32.mrb[8].mxu1  ;;  %v4133_v22 = vpop.f32.mrb[9].mxu0 }
 0x785   : > { %v4155_v17 = vpop.f32.mrb[9].mxu1  ;;  %v4134_v42 = vadd.f32 %v4133_v22, %v4132_v12  ;;  %v4135_v24 = vpop.f32.mrb[10].mxu0 }
 0x786   : > { %v4156_v44 = vadd.f32 %v4155_v17, %v4154_v11  ;;  %v4157_v47 = vpop.f32.mrb[10].mxu1  ;;  %v4136_v38 = vpop.f32.mrb[11].mxu0 }
 0x787   : > { %v4158_v43 = vpop.f32.mrb[11].mxu1  ;;  %v3557_v14 = vadd.f32 %v4134_v42, %v3517_v3 }
 0x789   : > { %v3597_v62 = vadd.f32 %v4156_v44, %v3557_v14 }
 0x7a3   : > { %v4176_v52 = vpop.f32.mrb[12].mxu0 }
 0x7a4   : > { %v4198_v59 = vpop.f32.mrb[12].mxu1  ;;  %v4177_v58 = vpop.f32.mrb[13].mxu0 }
 0x7a5   : > { %v4199_v23 = vpop.f32.mrb[13].mxu1  ;;  %v4178_v57 = vadd.f32 %v4177_v58, %v4176_v52  ;;  %v4179_v31 = vpop.f32.mrb[14].mxu0 }
 0x7a6   : > { %v4200_v18 = vadd.f32 %v4199_v23, %v4198_v59  ;;  %v4201_v48 = vpop.f32.mrb[14].mxu1  ;;  %v4180_v9 = vpop.f32.mrb[15].mxu0 }
 0x7a7   : > { %v4202_v37 = vpop.f32.mrb[15].mxu1  ;;  %v3637_v29 = vadd.f32 %v4178_v57, %v3597_v62 }
 0x7a9   : > { %v3677_v33 = vadd.f32 %v4200_v18, %v3637_v29 }
 0x7ab   : > { %3682 = vst [vmem:[#allocation3] sm:$0x1] %v3677_v33 }
 0x7ac PF: > { %p4340_p6 = scmp.eq.s32.totalorder %s4606_s10, 1  ;;  %s4549_s16 = smov [#allocation3]  }
 0x7ad   : > { %s3690_s17 = sshll.u32 %s4549_s16, 4  ;;  %s3691_s17 = int_to_ptr.vmem [resolvable:$true] %s3690_s17 }
 0x7ae   : > { %s4505_s18 = scalar_lea.vmem %s3691_s17, 16  ;;  %s4511_s19 = scalar_lea.vmem %s3691_s17, 32 }
 0x7af   : > { %p4506_p7 = scmp.ne.s32.totalorder %s3691_s17, %s4505_s18  ;;  %p4512_p10 = scmp.lt.s32.totalorder %s3691_s17, %s3691_s17 }
 0x7b0   : > { %p4513_p11 = scmp.lt.s32.totalorder %s4511_s19, %s4505_s18 }
 0x7b1   : > { %p4507_p8 = pnand %p4506_p7, %p4340_p6 }
 0x7b2   : > { %p4514_p12 = por %p4513_p11, %p4512_p10 }
 0x7b3   : > { %p4508_p9 = pneg %p4507_p8 }
 0x7b5   : > { %p4515_p13 = pnand %p4514_p12, %p4508_p9 }
 0x7b7   : > { %4518 = shalt.err (!%p4515_p13)
}
 0x7b8   : > { %s4519_s22 = scalar_lea.hbm %s5960_s9, 16 }
 0x7b9   : > { %p4520_p0 = scmp.ne.s32.totalorder %s5960_s9, %s4519_s22  ;;  %p4525_p3 = scmp.lt.u32.totalorder %s4519_s22, %s5960_s9 }
 0x7bb   : > { %p4521_p1 = pnand %p4520_p0, %p4340_p6 }
 0x7bd   : > { %p4522_p2 = pneg %p4521_p1 }
 0x7bf   : > { %p4527_p4 = pnand %p4525_p3, %p4522_p2 }
 0x7c1   : > { %4530 = shalt.err (!%p4527_p4)
}
 0x7c2   : > { %4337 = dma.vmem_to_hbm [thread:$0]  (%p4340_p6), %s3691_s17, 16, %s5960_s9, [#allocation4]  }
 0x7c3   : > { %4536 = dma.done.wait (%p4340_p6), [#allocation4], 16  }
 0x7c4   : > { %4538 = vsyncadd (%p4340_p6), [#allocation4], 4294967280 }
 0x7c5 PF: > { %s20_s30 = sadd.s32 1, %s4541_s30  }
 0x7c6   : > { %p17_p5 = scmp.ge.s32.totalorder %s20_s30, 4  }
 0x7c8   :  { %19 = sbr.rel (!%p17_p5) target bundleno = 1 (0x1), region = 91 }
 0x7cf   :  { %3703 = vsyncpa [#allocation4], 1 }
 0x7d0   :  { %3705 = vsyncpa [#allocation4 + $0x1], 1 }

</bundles_post_ra>
